<compile_context>
chip_gen: v6e
topology: v6e:2x2x1
jax: 0.10.0
libtpu: 0.0.40
codegen_flags: <defaults>
</compile_context>

<pallas_src>
from functools import partial

import numpy as np
import jax
import jax.numpy as jnp
from jax.experimental import pallas as pl
from jax.experimental.pallas import tpu as pltpu


def build_grid_laplacian(gy: int, gx: int) -> np.ndarray:
    """Graph Laplacian of the gy x gx structural-spring grid (row-major, gx fast)."""
    n = gy * gx
    L = np.zeros((n, n), np.float32)

    def idx(i, j):
        return i * gx + j

    for i in range(gy):
        for j in range(gx):
            a = idx(i, j)
            for di, dj in ((1, 0), (-1, 0), (0, 1), (0, -1)):
                ii, jj = i + di, j + dj
                if 0 <= ii < gy and 0 <= jj < gx:
                    L[a, idx(ii, jj)] += 1.0
                    L[a, a] -= 1.0
    return L


def _make_sim_kernel(*, n_steps: int, dt: float, n: int, ctrl_stride: int,
                     pin0: int, pin1: int, damping: float, gravity: float):
    """Builds the Pallas kernel closure (all structural constants are static)."""
    # Fully unroll short horizons; partially unroll long ones.
    unroll = True if n_steps <= 16 else 4

    def kernel(decay_ref, ctrl_ref, x0_ref, m_ref, x_out_ref):
        b = pl.program_id(0)                     # batch (one sim per grid step)
        decay = decay_ref[b]                     # SMEM scalar

        # Loop-invariant combined operator: M_eff = (dt/mass)*(ks*L - kb*L^2).
        M = m_ref[0]                             # (n, n) f32, stays in VMEM/vregs
        # TODO(synk): if the bundle dump shows Mosaic re-pushing this RHS into
        # the MXU every step, switch to explicit weight-stationary driving via
        # pltpu.matmul_push_rhs / matmul_acc_lhs / matmul_pop.

        x = x0_ref[0]                            # (3, n) f32
        v = jnp.zeros_like(x)                    # state_info_init.v == 0

        # One-time (pre-loop) constants: gravity impulse and attachment masks.
        row = jax.lax.broadcasted_iota(jnp.int32, (3, n), 0)
        col = jax.lax.broadcasted_iota(jnp.int32, (3, n), 1)
        g_dt = jnp.where(row == 2, jnp.float32(dt * gravity), jnp.float32(0.0))
        m0 = (col == pin0).astype(jnp.float32)   # attachment vertex 0
        m1 = (col == pin1).astype(jnp.float32)   # attachment vertex 14
        m01 = m0 + m1
        keep = 1.0 - m01
        # sel[r][p] is 1.0 only at (row r, pinned column p): scatters the 6
        # control scalars of this step into the (3, n) state with plain FMAs.
        sel = []
        for r in range(3):
            rf = (row == r).astype(jnp.float32)
            sel.append((rf * m0, rf * m1))

        base = b * ctrl_stride
        dt_f = jnp.float32(dt)
        damp = jnp.float32(damping)

        def body(t, carry):
            x, v = carry
            # Hot path: one MXU matmul = dt * (stretch + bend) acceleration.
            dv = jnp.dot(x, M, preferred_element_type=jnp.float32)   # (3, n)
            v = (v + dv + g_dt) * damp
            x = x + dt_f * v

            # Attachment control targets for this step (two 3D points, db_pos),
            # blended toward the pinned vertices with `decay` (masked FMA form:
            # at a pinned entry x <- (1-decay)*x + decay*c; elsewhere unchanged).
            off = base + 6 * t
            tgt = (sel[0][0] * ctrl_ref[off + 0] + sel[1][0] * ctrl_ref[off + 1]
                   + sel[2][0] * ctrl_ref[off + 2] + sel[0][1] * ctrl_ref[off + 3]
                   + sel[1][1] * ctrl_ref[off + 4] + sel[2][1] * ctrl_ref[off + 5])
            x = x + decay * (tgt - m01 * x)
            v = v * keep                          # pinned vertices: zero velocity
            return (x, v)

        x, v = jax.lax.fori_loop(0, n_steps, body, (x, v), unroll=unroll)
        x_out_ref[0] = x

    return kernel


def _run_sim_batch(m_eff, x0, ctrl_flat, decay, *, n_steps, dt, ctrl_stride,
                   pin0=0, pin1=14, damping=0.995, gravity=-9.8):
    """Runs B independent simulations; grid axis is 'parallel' (megacore-shardable)."""
    B, _, n = x0.shape
    kernel = _make_sim_kernel(n_steps=int(n_steps), dt=float(dt), n=int(n),
                              ctrl_stride=int(ctrl_stride), pin0=pin0, pin1=pin1,
                              damping=damping, gravity=gravity)
    return pl.pallas_call(
        kernel,
        out_shape=jax.ShapeDtypeStruct((B, 3, n), jnp.float32),
        grid=(B,),
        in_specs=[
            pl.BlockSpec(memory_space=pltpu.MemorySpace.SMEM),      # decay (B,)
            pl.BlockSpec(memory_space=pltpu.MemorySpace.SMEM),      # ctrl (B*T*6,)
            pl.BlockSpec((1, 3, n), lambda b: (b, 0, 0)),           # x0  (B,3,N)
            pl.BlockSpec((1, n, n), lambda b: (b, 0, 0)),           # M_eff (B,N,N)
        ],
        out_specs=pl.BlockSpec((1, 3, n), lambda b: (b, 0, 0)),
        compiler_params=pltpu.CompilerParams(
            dimension_semantics=("parallel",)),
    )(decay, ctrl_flat, x0, m_eff)


@partial(jax.jit, static_argnames=("time_step", "n_time_steps", "grid_num"))
def sim_deform_forward(phy_log, coordinates, position_control, decay, *,
                       time_step, n_time_steps, grid_num):
    """Mirrors SimDeform.forward.  Returns the final flattened particle positions x."""
    gx, gy = grid_num
    n = gx * gy

    # --- parameter setup glue (mirrors torch.exp(self.phy_params)) ---
    phy = jnp.exp(phy_log.astype(jnp.float32))                      # (5,)
    # db_pos = cat(position_control[:, :3], position_control[:, 3:]) == position_control
    db_pos = jnp.concatenate(
        [position_control[:, :3], position_control[:, 3:]], axis=1).astype(jnp.float32)
    T = db_pos.shape[0]
    ctrl_flat = db_pos.reshape(-1)                                   # (T*6,) -> 1D SMEM

    # --- precombined force operator (loop-invariant), fused into this jit ---
    L_np = build_grid_laplacian(gy, gx)                              # static numpy
    L = jnp.asarray(L_np, jnp.float32)                               # (N, N)
    L2 = jnp.asarray(L_np @ L_np, jnp.float32)                       # bi-Laplacian
    cloth_dim_x, cloth_dim_y = 7.0, 8.0                              # fabric.clothDimX/Y
    cell_area = (cloth_dim_x / (gx - 1)) * (cloth_dim_y / (gy - 1))
    mass = phy[4] * jnp.float32(cell_area)                           # density * area
    m_eff = (jnp.float32(time_step) / mass) * (phy[2] * L - phy[3] * L2)   # (N, N)

    # --- state layout glue: (N, 3) -> (3, N) channels-first ---
    x0 = coordinates.astype(jnp.float32).T                           # (3, N)
    decay_arr = jnp.asarray(decay, jnp.float32).reshape((1,))

    x_final = _run_sim_batch(
        m_eff[None], x0[None], ctrl_flat, decay_arr,
        n_steps=n_time_steps, dt=time_step, ctrl_stride=T * 6)

    # The dfc sim returns x as a flat [x0, y0, z0, x1, ...] vector.
    return x_final[0].T.reshape(-1)


if __name__ == "__main__":
    key = jax.random.PRNGKey(0)
    k_phy, k_coord, k_ctrl = jax.random.split(key, 3)

    # Small shapes consistent with the module.
    gridNumX, gridNumY = 16, 8
    N = gridNumX * gridNumY                  # 128 particles
    n_time_steps = 8
    time_step = 1e-3
    decay = 0.5

    # Deterministic parameter init (mirrors SimDeform.__init__):
    #   phy_params = log([1, 10, 2442.31, 0.21, 0.8] + (rand(5)-0.5)*phy_scales)
    base = jnp.array([1.0, 10.0, 2442.31, 0.21, 0.8], jnp.float32)
    phy_scales = jnp.array([100.0, 100.0, 8.0, 0.5, 1e-8], jnp.float32)
    u = jax.random.uniform(k_phy, (5,), jnp.float32)
    # clamp to keep log() finite for the synthetic init
    phy_log = jnp.log(jnp.maximum(base + (u - 0.5) * phy_scales, 1e-3))

    # coordinates: initial particle positions of the 7 x 8 cloth grid (+ tiny noise)
    xs = jnp.linspace(0.0, 7.0, gridNumX)
    ys = jnp.linspace(0.0, 8.0, gridNumY)
    gxm, gym = jnp.meshgrid(xs, ys, indexing="xy")          # (gridNumY, gridNumX)
    coordinates = jnp.stack(
        [gxm.reshape(-1), gym.reshape(-1), jnp.zeros((N,), jnp.float32)], axis=1)
    coordinates = coordinates + 0.01 * jax.random.normal(k_coord, (N, 3), jnp.float32)

    # position_control: trajectory of the two attachment points, (T, 6)
    position_control = coordinates[jnp.array([0, 14])].reshape(1, 6) \
        + 0.05 * jax.random.normal(k_ctrl, (n_time_steps, 6), jnp.float32)

    x = sim_deform_forward(
        phy_log, coordinates, position_control, decay,
        time_step=time_step, n_time_steps=n_time_steps,
        grid_num=(gridNumX, gridNumY))

    x = jax.block_until_ready(x)
    assert x.shape == (N * 3,), x.shape
    assert bool(jnp.all(jnp.isfinite(x)))
    print("KERNEL_OK")
</pallas_src>

<mosaic_0001>
module attributes {stable_mosaic.version = 11 : i64} {
  func.func @kernel(%arg0: i32, %arg1: memref<1xf32, #tpu.memory_space<smem>>, %arg2: memref<48xf32, #tpu.memory_space<smem>>, %arg3: memref<1x3x128xf32, #tpu.memory_space<vmem>>, %arg4: memref<1x128x128xf32, #tpu.memory_space<vmem>>, %arg5: memref<1x3x128xf32, #tpu.memory_space<vmem>>) attributes {dimension_semantics = [#tpu.dimension_semantics<parallel>], iteration_bounds = array<i64: 1>, scalar_prefetch = 0 : i64, scratch_operands = 0 : i64, tpu.core_type = #tpu.core_type<tc>, window_params = [{transform_indices = @transform_0, window_bounds = array<i64: 1>}, {transform_indices = @transform_1, window_bounds = array<i64: 48>}, {transform_indices = @transform_2, window_bounds = array<i64: 1, 3, 128>}, {transform_indices = @transform_3, window_bounds = array<i64: 1, 128, 128>}, {transform_indices = @transform_4, window_bounds = array<i64: 1, 3, 128>}]} {
    %0 = arith.index_cast %arg0 : i32 to index
    %1 = memref.load %arg1[%0] : memref<1xf32, #tpu.memory_space<smem>>
    %c0 = arith.constant 0 : index
    %c0_0 = arith.constant 0 : index
    %c0_1 = arith.constant 0 : index
    %2 = vector.load %arg4[%c0, %c0_0, %c0_1] : memref<1x128x128xf32, #tpu.memory_space<vmem>>, vector<1x128x128xf32>
    %3 = vector.shape_cast %2 : vector<1x128x128xf32> to vector<128x128xf32>
    %c0_2 = arith.constant 0 : index
    %c0_3 = arith.constant 0 : index
    %c0_4 = arith.constant 0 : index
    %4 = vector.load %arg3[%c0_2, %c0_3, %c0_4] : memref<1x3x128xf32, #tpu.memory_space<vmem>>, vector<1x3x128xf32>
    %5 = vector.shape_cast %4 : vector<1x3x128xf32> to vector<3x128xf32>
    %cst = arith.constant 0.000000e+00 : f32
    %6 = vector.broadcast %cst : f32 to vector<3x128xf32>
    %7 = tpu.iota {dimensions = array<i32: 0>} : vector<3x128xi32>
    %8 = tpu.iota {dimensions = array<i32: 1>} : vector<3x128xi32>
    %c2_i32 = arith.constant 2 : i32
    %9 = vector.broadcast %c2_i32 : i32 to vector<3x128xi32>
    %10 = arith.cmpi eq, %7, %9 : vector<3x128xi32>
    %cst_5 = arith.constant -9.800000e-03 : f32
    %cst_6 = arith.constant 0.000000e+00 : f32
    %11 = vector.broadcast %cst_5 : f32 to vector<3x128xf32>
    %12 = vector.broadcast %cst_6 : f32 to vector<3x128xf32>
    %13 = arith.select %10, %11, %12 : vector<3x128xi1>, vector<3x128xf32>
    %c0_i32 = arith.constant 0 : i32
    %14 = vector.broadcast %c0_i32 : i32 to vector<3x128xi32>
    %15 = arith.cmpi eq, %8, %14 : vector<3x128xi32>
    %16 = arith.extui %15 : vector<3x128xi1> to vector<3x128xi32>
    %17 = arith.sitofp %16 : vector<3x128xi32> to vector<3x128xf32>
    %c14_i32 = arith.constant 14 : i32
    %18 = vector.broadcast %c14_i32 : i32 to vector<3x128xi32>
    %19 = arith.cmpi eq, %8, %18 : vector<3x128xi32>
    %20 = arith.extui %19 : vector<3x128xi1> to vector<3x128xi32>
    %21 = arith.sitofp %20 : vector<3x128xi32> to vector<3x128xf32>
    %22 = arith.addf %17, %21 : vector<3x128xf32>
    %cst_7 = arith.constant 1.000000e+00 : f32
    %23 = vector.broadcast %cst_7 : f32 to vector<3x128xf32>
    %24 = arith.subf %23, %22 : vector<3x128xf32>
    %c0_i32_8 = arith.constant 0 : i32
    %25 = vector.broadcast %c0_i32_8 : i32 to vector<3x128xi32>
    %26 = arith.cmpi eq, %7, %25 : vector<3x128xi32>
    %27 = arith.extui %26 : vector<3x128xi1> to vector<3x128xi32>
    %28 = arith.sitofp %27 : vector<3x128xi32> to vector<3x128xf32>
    %29 = arith.mulf %28, %17 : vector<3x128xf32>
    %30 = arith.mulf %28, %21 : vector<3x128xf32>
    %c1_i32 = arith.constant 1 : i32
    %31 = vector.broadcast %c1_i32 : i32 to vector<3x128xi32>
    %32 = arith.cmpi eq, %7, %31 : vector<3x128xi32>
    %33 = arith.extui %32 : vector<3x128xi1> to vector<3x128xi32>
    %34 = arith.sitofp %33 : vector<3x128xi32> to vector<3x128xf32>
    %35 = arith.mulf %34, %17 : vector<3x128xf32>
    %36 = arith.mulf %34, %21 : vector<3x128xf32>
    %c2_i32_9 = arith.constant 2 : i32
    %37 = vector.broadcast %c2_i32_9 : i32 to vector<3x128xi32>
    %38 = arith.cmpi eq, %7, %37 : vector<3x128xi32>
    %39 = arith.extui %38 : vector<3x128xi1> to vector<3x128xi32>
    %40 = arith.sitofp %39 : vector<3x128xi32> to vector<3x128xf32>
    %41 = arith.mulf %40, %17 : vector<3x128xf32>
    %42 = arith.mulf %40, %21 : vector<3x128xf32>
    %c48_i32 = arith.constant 48 : i32
    %43 = arith.muli %arg0, %c48_i32 : i32
    %cst_10 = arith.constant 9.950000e-01 : f32
    %cst_11 = arith.constant 1.000000e-03 : f32
    %c0_i32_12 = arith.constant 0 : i32
    %cst_13 = arith.constant dense<0.000000e+00> : vector<3x128xf32>
    %44 = tpu.matmul %5, %3, %cst_13 {dimension_numbers = #tpu.dot_dimension_numbers<[1], [0], [0], [1], [0, 0, 1, 1], [], []>} : vector<3x128xf32>, vector<128x128xf32>, vector<3x128xf32> -> vector<3x128xf32>
    %45 = arith.addf %6, %44 : vector<3x128xf32>
    %46 = arith.addf %45, %13 : vector<3x128xf32>
    %47 = vector.broadcast %cst_10 : f32 to vector<3x128xf32>
    %48 = arith.mulf %46, %47 : vector<3x128xf32>
    %49 = vector.broadcast %cst_11 : f32 to vector<3x128xf32>
    %50 = arith.mulf %49, %48 : vector<3x128xf32>
    %51 = arith.addf %5, %50 : vector<3x128xf32>
    %c6_i32 = arith.constant 6 : i32
    %52 = arith.muli %c6_i32, %c0_i32_12 : i32
    %53 = arith.addi %43, %52 : i32
    %c0_i32_14 = arith.constant 0 : i32
    %54 = arith.addi %53, %c0_i32_14 : i32
    %55 = arith.index_cast %54 : i32 to index
    %56 = memref.load %arg2[%55] : memref<48xf32, #tpu.memory_space<smem>>
    %57 = vector.broadcast %56 : f32 to vector<3x128xf32>
    %58 = arith.mulf %29, %57 : vector<3x128xf32>
    %c1_i32_15 = arith.constant 1 : i32
    %59 = arith.addi %53, %c1_i32_15 : i32
    %60 = arith.index_cast %59 : i32 to index
    %61 = memref.load %arg2[%60] : memref<48xf32, #tpu.memory_space<smem>>
    %62 = vector.broadcast %61 : f32 to vector<3x128xf32>
    %63 = arith.mulf %35, %62 : vector<3x128xf32>
    %64 = arith.addf %58, %63 : vector<3x128xf32>
    %c2_i32_16 = arith.constant 2 : i32
    %65 = arith.addi %53, %c2_i32_16 : i32
    %66 = arith.index_cast %65 : i32 to index
    %67 = memref.load %arg2[%66] : memref<48xf32, #tpu.memory_space<smem>>
    %68 = vector.broadcast %67 : f32 to vector<3x128xf32>
    %69 = arith.mulf %41, %68 : vector<3x128xf32>
    %70 = arith.addf %64, %69 : vector<3x128xf32>
    %c3_i32 = arith.constant 3 : i32
    %71 = arith.addi %53, %c3_i32 : i32
    %72 = arith.index_cast %71 : i32 to index
    %73 = memref.load %arg2[%72] : memref<48xf32, #tpu.memory_space<smem>>
    %74 = vector.broadcast %73 : f32 to vector<3x128xf32>
    %75 = arith.mulf %30, %74 : vector<3x128xf32>
    %76 = arith.addf %70, %75 : vector<3x128xf32>
    %c4_i32 = arith.constant 4 : i32
    %77 = arith.addi %53, %c4_i32 : i32
    %78 = arith.index_cast %77 : i32 to index
    %79 = memref.load %arg2[%78] : memref<48xf32, #tpu.memory_space<smem>>
    %80 = vector.broadcast %79 : f32 to vector<3x128xf32>
    %81 = arith.mulf %36, %80 : vector<3x128xf32>
    %82 = arith.addf %76, %81 : vector<3x128xf32>
    %c5_i32 = arith.constant 5 : i32
    %83 = arith.addi %53, %c5_i32 : i32
    %84 = arith.index_cast %83 : i32 to index
    %85 = memref.load %arg2[%84] : memref<48xf32, #tpu.memory_space<smem>>
    %86 = vector.broadcast %85 : f32 to vector<3x128xf32>
    %87 = arith.mulf %42, %86 : vector<3x128xf32>
    %88 = arith.addf %82, %87 : vector<3x128xf32>
    %89 = arith.mulf %22, %51 : vector<3x128xf32>
    %90 = arith.subf %88, %89 : vector<3x128xf32>
    %91 = vector.broadcast %1 : f32 to vector<3x128xf32>
    %92 = arith.mulf %91, %90 : vector<3x128xf32>
    %93 = arith.addf %51, %92 : vector<3x128xf32>
    %94 = arith.mulf %48, %24 : vector<3x128xf32>
    %c1_i32_17 = arith.constant 1 : i32
    %cst_18 = arith.constant dense<0.000000e+00> : vector<3x128xf32>
    %95 = tpu.matmul %93, %3, %cst_18 {dimension_numbers = #tpu.dot_dimension_numbers<[1], [0], [0], [1], [0, 0, 1, 1], [], []>} : vector<3x128xf32>, vector<128x128xf32>, vector<3x128xf32> -> vector<3x128xf32>
    %96 = arith.addf %94, %95 : vector<3x128xf32>
    %97 = arith.addf %96, %13 : vector<3x128xf32>
    %98 = vector.broadcast %cst_10 : f32 to vector<3x128xf32>
    %99 = arith.mulf %97, %98 : vector<3x128xf32>
    %100 = vector.broadcast %cst_11 : f32 to vector<3x128xf32>
    %101 = arith.mulf %100, %99 : vector<3x128xf32>
    %102 = arith.addf %93, %101 : vector<3x128xf32>
    %c6_i32_19 = arith.constant 6 : i32
    %103 = arith.muli %c6_i32_19, %c1_i32_17 : i32
    %104 = arith.addi %43, %103 : i32
    %c0_i32_20 = arith.constant 0 : i32
    %105 = arith.addi %104, %c0_i32_20 : i32
    %106 = arith.index_cast %105 : i32 to index
    %107 = memref.load %arg2[%106] : memref<48xf32, #tpu.memory_space<smem>>
    %108 = vector.broadcast %107 : f32 to vector<3x128xf32>
    %109 = arith.mulf %29, %108 : vector<3x128xf32>
    %c1_i32_21 = arith.constant 1 : i32
    %110 = arith.addi %104, %c1_i32_21 : i32
    %111 = arith.index_cast %110 : i32 to index
    %112 = memref.load %arg2[%111] : memref<48xf32, #tpu.memory_space<smem>>
    %113 = vector.broadcast %112 : f32 to vector<3x128xf32>
    %114 = arith.mulf %35, %113 : vector<3x128xf32>
    %115 = arith.addf %109, %114 : vector<3x128xf32>
    %c2_i32_22 = arith.constant 2 : i32
    %116 = arith.addi %104, %c2_i32_22 : i32
    %117 = arith.index_cast %116 : i32 to index
    %118 = memref.load %arg2[%117] : memref<48xf32, #tpu.memory_space<smem>>
    %119 = vector.broadcast %118 : f32 to vector<3x128xf32>
    %120 = arith.mulf %41, %119 : vector<3x128xf32>
    %121 = arith.addf %115, %120 : vector<3x128xf32>
    %c3_i32_23 = arith.constant 3 : i32
    %122 = arith.addi %104, %c3_i32_23 : i32
    %123 = arith.index_cast %122 : i32 to index
    %124 = memref.load %arg2[%123] : memref<48xf32, #tpu.memory_space<smem>>
    %125 = vector.broadcast %124 : f32 to vector<3x128xf32>
    %126 = arith.mulf %30, %125 : vector<3x128xf32>
    %127 = arith.addf %121, %126 : vector<3x128xf32>
    %c4_i32_24 = arith.constant 4 : i32
    %128 = arith.addi %104, %c4_i32_24 : i32
    %129 = arith.index_cast %128 : i32 to index
    %130 = memref.load %arg2[%129] : memref<48xf32, #tpu.memory_space<smem>>
    %131 = vector.broadcast %130 : f32 to vector<3x128xf32>
    %132 = arith.mulf %36, %131 : vector<3x128xf32>
    %133 = arith.addf %127, %132 : vector<3x128xf32>
    %c5_i32_25 = arith.constant 5 : i32
    %134 = arith.addi %104, %c5_i32_25 : i32
    %135 = arith.index_cast %134 : i32 to index
    %136 = memref.load %arg2[%135] : memref<48xf32, #tpu.memory_space<smem>>
    %137 = vector.broadcast %136 : f32 to vector<3x128xf32>
    %138 = arith.mulf %42, %137 : vector<3x128xf32>
    %139 = arith.addf %133, %138 : vector<3x128xf32>
    %140 = arith.mulf %22, %102 : vector<3x128xf32>
    %141 = arith.subf %139, %140 : vector<3x128xf32>
    %142 = vector.broadcast %1 : f32 to vector<3x128xf32>
    %143 = arith.mulf %142, %141 : vector<3x128xf32>
    %144 = arith.addf %102, %143 : vector<3x128xf32>
    %145 = arith.mulf %99, %24 : vector<3x128xf32>
    %c2_i32_26 = arith.constant 2 : i32
    %cst_27 = arith.constant dense<0.000000e+00> : vector<3x128xf32>
    %146 = tpu.matmul %144, %3, %cst_27 {dimension_numbers = #tpu.dot_dimension_numbers<[1], [0], [0], [1], [0, 0, 1, 1], [], []>} : vector<3x128xf32>, vector<128x128xf32>, vector<3x128xf32> -> vector<3x128xf32>
    %147 = arith.addf %145, %146 : vector<3x128xf32>
    %148 = arith.addf %147, %13 : vector<3x128xf32>
    %149 = vector.broadcast %cst_10 : f32 to vector<3x128xf32>
    %150 = arith.mulf %148, %149 : vector<3x128xf32>
    %151 = vector.broadcast %cst_11 : f32 to vector<3x128xf32>
    %152 = arith.mulf %151, %150 : vector<3x128xf32>
    %153 = arith.addf %144, %152 : vector<3x128xf32>
    %c6_i32_28 = arith.constant 6 : i32
    %154 = arith.muli %c6_i32_28, %c2_i32_26 : i32
    %155 = arith.addi %43, %154 : i32
    %c0_i32_29 = arith.constant 0 : i32
    %156 = arith.addi %155, %c0_i32_29 : i32
    %157 = arith.index_cast %156 : i32 to index
    %158 = memref.load %arg2[%157] : memref<48xf32, #tpu.memory_space<smem>>
    %159 = vector.broadcast %158 : f32 to vector<3x128xf32>
    %160 = arith.mulf %29, %159 : vector<3x128xf32>
    %c1_i32_30 = arith.constant 1 : i32
    %161 = arith.addi %155, %c1_i32_30 : i32
    %162 = arith.index_cast %161 : i32 to index
    %163 = memref.load %arg2[%162] : memref<48xf32, #tpu.memory_space<smem>>
    %164 = vector.broadcast %163 : f32 to vector<3x128xf32>
    %165 = arith.mulf %35, %164 : vector<3x128xf32>
    %166 = arith.addf %160, %165 : vector<3x128xf32>
    %c2_i32_31 = arith.constant 2 : i32
    %167 = arith.addi %155, %c2_i32_31 : i32
    %168 = arith.index_cast %167 : i32 to index
    %169 = memref.load %arg2[%168] : memref<48xf32, #tpu.memory_space<smem>>
    %170 = vector.broadcast %169 : f32 to vector<3x128xf32>
    %171 = arith.mulf %41, %170 : vector<3x128xf32>
    %172 = arith.addf %166, %171 : vector<3x128xf32>
    %c3_i32_32 = arith.constant 3 : i32
    %173 = arith.addi %155, %c3_i32_32 : i32
    %174 = arith.index_cast %173 : i32 to index
    %175 = memref.load %arg2[%174] : memref<48xf32, #tpu.memory_space<smem>>
    %176 = vector.broadcast %175 : f32 to vector<3x128xf32>
    %177 = arith.mulf %30, %176 : vector<3x128xf32>
    %178 = arith.addf %172, %177 : vector<3x128xf32>
    %c4_i32_33 = arith.constant 4 : i32
    %179 = arith.addi %155, %c4_i32_33 : i32
    %180 = arith.index_cast %179 : i32 to index
    %181 = memref.load %arg2[%180] : memref<48xf32, #tpu.memory_space<smem>>
    %182 = vector.broadcast %181 : f32 to vector<3x128xf32>
    %183 = arith.mulf %36, %182 : vector<3x128xf32>
    %184 = arith.addf %178, %183 : vector<3x128xf32>
    %c5_i32_34 = arith.constant 5 : i32
    %185 = arith.addi %155, %c5_i32_34 : i32
    %186 = arith.index_cast %185 : i32 to index
    %187 = memref.load %arg2[%186] : memref<48xf32, #tpu.memory_space<smem>>
    %188 = vector.broadcast %187 : f32 to vector<3x128xf32>
    %189 = arith.mulf %42, %188 : vector<3x128xf32>
    %190 = arith.addf %184, %189 : vector<3x128xf32>
    %191 = arith.mulf %22, %153 : vector<3x128xf32>
    %192 = arith.subf %190, %191 : vector<3x128xf32>
    %193 = vector.broadcast %1 : f32 to vector<3x128xf32>
    %194 = arith.mulf %193, %192 : vector<3x128xf32>
    %195 = arith.addf %153, %194 : vector<3x128xf32>
    %196 = arith.mulf %150, %24 : vector<3x128xf32>
    %c3_i32_35 = arith.constant 3 : i32
    %cst_36 = arith.constant dense<0.000000e+00> : vector<3x128xf32>
    %197 = tpu.matmul %195, %3, %cst_36 {dimension_numbers = #tpu.dot_dimension_numbers<[1], [0], [0], [1], [0, 0, 1, 1], [], []>} : vector<3x128xf32>, vector<128x128xf32>, vector<3x128xf32> -> vector<3x128xf32>
    %198 = arith.addf %196, %197 : vector<3x128xf32>
    %199 = arith.addf %198, %13 : vector<3x128xf32>
    %200 = vector.broadcast %cst_10 : f32 to vector<3x128xf32>
    %201 = arith.mulf %199, %200 : vector<3x128xf32>
    %202 = vector.broadcast %cst_11 : f32 to vector<3x128xf32>
    %203 = arith.mulf %202, %201 : vector<3x128xf32>
    %204 = arith.addf %195, %203 : vector<3x128xf32>
    %c6_i32_37 = arith.constant 6 : i32
    %205 = arith.muli %c6_i32_37, %c3_i32_35 : i32
    %206 = arith.addi %43, %205 : i32
    %c0_i32_38 = arith.constant 0 : i32
    %207 = arith.addi %206, %c0_i32_38 : i32
    %208 = arith.index_cast %207 : i32 to index
    %209 = memref.load %arg2[%208] : memref<48xf32, #tpu.memory_space<smem>>
    %210 = vector.broadcast %209 : f32 to vector<3x128xf32>
    %211 = arith.mulf %29, %210 : vector<3x128xf32>
    %c1_i32_39 = arith.constant 1 : i32
    %212 = arith.addi %206, %c1_i32_39 : i32
    %213 = arith.index_cast %212 : i32 to index
    %214 = memref.load %arg2[%213] : memref<48xf32, #tpu.memory_space<smem>>
    %215 = vector.broadcast %214 : f32 to vector<3x128xf32>
    %216 = arith.mulf %35, %215 : vector<3x128xf32>
    %217 = arith.addf %211, %216 : vector<3x128xf32>
    %c2_i32_40 = arith.constant 2 : i32
    %218 = arith.addi %206, %c2_i32_40 : i32
    %219 = arith.index_cast %218 : i32 to index
    %220 = memref.load %arg2[%219] : memref<48xf32, #tpu.memory_space<smem>>
    %221 = vector.broadcast %220 : f32 to vector<3x128xf32>
    %222 = arith.mulf %41, %221 : vector<3x128xf32>
    %223 = arith.addf %217, %222 : vector<3x128xf32>
    %c3_i32_41 = arith.constant 3 : i32
    %224 = arith.addi %206, %c3_i32_41 : i32
    %225 = arith.index_cast %224 : i32 to index
    %226 = memref.load %arg2[%225] : memref<48xf32, #tpu.memory_space<smem>>
    %227 = vector.broadcast %226 : f32 to vector<3x128xf32>
    %228 = arith.mulf %30, %227 : vector<3x128xf32>
    %229 = arith.addf %223, %228 : vector<3x128xf32>
    %c4_i32_42 = arith.constant 4 : i32
    %230 = arith.addi %206, %c4_i32_42 : i32
    %231 = arith.index_cast %230 : i32 to index
    %232 = memref.load %arg2[%231] : memref<48xf32, #tpu.memory_space<smem>>
    %233 = vector.broadcast %232 : f32 to vector<3x128xf32>
    %234 = arith.mulf %36, %233 : vector<3x128xf32>
    %235 = arith.addf %229, %234 : vector<3x128xf32>
    %c5_i32_43 = arith.constant 5 : i32
    %236 = arith.addi %206, %c5_i32_43 : i32
    %237 = arith.index_cast %236 : i32 to index
    %238 = memref.load %arg2[%237] : memref<48xf32, #tpu.memory_space<smem>>
    %239 = vector.broadcast %238 : f32 to vector<3x128xf32>
    %240 = arith.mulf %42, %239 : vector<3x128xf32>
    %241 = arith.addf %235, %240 : vector<3x128xf32>
    %242 = arith.mulf %22, %204 : vector<3x128xf32>
    %243 = arith.subf %241, %242 : vector<3x128xf32>
    %244 = vector.broadcast %1 : f32 to vector<3x128xf32>
    %245 = arith.mulf %244, %243 : vector<3x128xf32>
    %246 = arith.addf %204, %245 : vector<3x128xf32>
    %247 = arith.mulf %201, %24 : vector<3x128xf32>
    %c4_i32_44 = arith.constant 4 : i32
    %cst_45 = arith.constant dense<0.000000e+00> : vector<3x128xf32>
    %248 = tpu.matmul %246, %3, %cst_45 {dimension_numbers = #tpu.dot_dimension_numbers<[1], [0], [0], [1], [0, 0, 1, 1], [], []>} : vector<3x128xf32>, vector<128x128xf32>, vector<3x128xf32> -> vector<3x128xf32>
    %249 = arith.addf %247, %248 : vector<3x128xf32>
    %250 = arith.addf %249, %13 : vector<3x128xf32>
    %251 = vector.broadcast %cst_10 : f32 to vector<3x128xf32>
    %252 = arith.mulf %250, %251 : vector<3x128xf32>
    %253 = vector.broadcast %cst_11 : f32 to vector<3x128xf32>
    %254 = arith.mulf %253, %252 : vector<3x128xf32>
    %255 = arith.addf %246, %254 : vector<3x128xf32>
    %c6_i32_46 = arith.constant 6 : i32
    %256 = arith.muli %c6_i32_46, %c4_i32_44 : i32
    %257 = arith.addi %43, %256 : i32
    %c0_i32_47 = arith.constant 0 : i32
    %258 = arith.addi %257, %c0_i32_47 : i32
    %259 = arith.index_cast %258 : i32 to index
    %260 = memref.load %arg2[%259] : memref<48xf32, #tpu.memory_space<smem>>
    %261 = vector.broadcast %260 : f32 to vector<3x128xf32>
    %262 = arith.mulf %29, %261 : vector<3x128xf32>
    %c1_i32_48 = arith.constant 1 : i32
    %263 = arith.addi %257, %c1_i32_48 : i32
    %264 = arith.index_cast %263 : i32 to index
    %265 = memref.load %arg2[%264] : memref<48xf32, #tpu.memory_space<smem>>
    %266 = vector.broadcast %265 : f32 to vector<3x128xf32>
    %267 = arith.mulf %35, %266 : vector<3x128xf32>
    %268 = arith.addf %262, %267 : vector<3x128xf32>
    %c2_i32_49 = arith.constant 2 : i32
    %269 = arith.addi %257, %c2_i32_49 : i32
    %270 = arith.index_cast %269 : i32 to index
    %271 = memref.load %arg2[%270] : memref<48xf32, #tpu.memory_space<smem>>
    %272 = vector.broadcast %271 : f32 to vector<3x128xf32>
    %273 = arith.mulf %41, %272 : vector<3x128xf32>
    %274 = arith.addf %268, %273 : vector<3x128xf32>
    %c3_i32_50 = arith.constant 3 : i32
    %275 = arith.addi %257, %c3_i32_50 : i32
    %276 = arith.index_cast %275 : i32 to index
    %277 = memref.load %arg2[%276] : memref<48xf32, #tpu.memory_space<smem>>
    %278 = vector.broadcast %277 : f32 to vector<3x128xf32>
    %279 = arith.mulf %30, %278 : vector<3x128xf32>
    %280 = arith.addf %274, %279 : vector<3x128xf32>
    %c4_i32_51 = arith.constant 4 : i32
    %281 = arith.addi %257, %c4_i32_51 : i32
    %282 = arith.index_cast %281 : i32 to index
    %283 = memref.load %arg2[%282] : memref<48xf32, #tpu.memory_space<smem>>
    %284 = vector.broadcast %283 : f32 to vector<3x128xf32>
    %285 = arith.mulf %36, %284 : vector<3x128xf32>
    %286 = arith.addf %280, %285 : vector<3x128xf32>
    %c5_i32_52 = arith.constant 5 : i32
    %287 = arith.addi %257, %c5_i32_52 : i32
    %288 = arith.index_cast %287 : i32 to index
    %289 = memref.load %arg2[%288] : memref<48xf32, #tpu.memory_space<smem>>
    %290 = vector.broadcast %289 : f32 to vector<3x128xf32>
    %291 = arith.mulf %42, %290 : vector<3x128xf32>
    %292 = arith.addf %286, %291 : vector<3x128xf32>
    %293 = arith.mulf %22, %255 : vector<3x128xf32>
    %294 = arith.subf %292, %293 : vector<3x128xf32>
    %295 = vector.broadcast %1 : f32 to vector<3x128xf32>
    %296 = arith.mulf %295, %294 : vector<3x128xf32>
    %297 = arith.addf %255, %296 : vector<3x128xf32>
    %298 = arith.mulf %252, %24 : vector<3x128xf32>
    %c5_i32_53 = arith.constant 5 : i32
    %cst_54 = arith.constant dense<0.000000e+00> : vector<3x128xf32>
    %299 = tpu.matmul %297, %3, %cst_54 {dimension_numbers = #tpu.dot_dimension_numbers<[1], [0], [0], [1], [0, 0, 1, 1], [], []>} : vector<3x128xf32>, vector<128x128xf32>, vector<3x128xf32> -> vector<3x128xf32>
    %300 = arith.addf %298, %299 : vector<3x128xf32>
    %301 = arith.addf %300, %13 : vector<3x128xf32>
    %302 = vector.broadcast %cst_10 : f32 to vector<3x128xf32>
    %303 = arith.mulf %301, %302 : vector<3x128xf32>
    %304 = vector.broadcast %cst_11 : f32 to vector<3x128xf32>
    %305 = arith.mulf %304, %303 : vector<3x128xf32>
    %306 = arith.addf %297, %305 : vector<3x128xf32>
    %c6_i32_55 = arith.constant 6 : i32
    %307 = arith.muli %c6_i32_55, %c5_i32_53 : i32
    %308 = arith.addi %43, %307 : i32
    %c0_i32_56 = arith.constant 0 : i32
    %309 = arith.addi %308, %c0_i32_56 : i32
    %310 = arith.index_cast %309 : i32 to index
    %311 = memref.load %arg2[%310] : memref<48xf32, #tpu.memory_space<smem>>
    %312 = vector.broadcast %311 : f32 to vector<3x128xf32>
    %313 = arith.mulf %29, %312 : vector<3x128xf32>
    %c1_i32_57 = arith.constant 1 : i32
    %314 = arith.addi %308, %c1_i32_57 : i32
    %315 = arith.index_cast %314 : i32 to index
    %316 = memref.load %arg2[%315] : memref<48xf32, #tpu.memory_space<smem>>
    %317 = vector.broadcast %316 : f32 to vector<3x128xf32>
    %318 = arith.mulf %35, %317 : vector<3x128xf32>
    %319 = arith.addf %313, %318 : vector<3x128xf32>
    %c2_i32_58 = arith.constant 2 : i32
    %320 = arith.addi %308, %c2_i32_58 : i32
    %321 = arith.index_cast %320 : i32 to index
    %322 = memref.load %arg2[%321] : memref<48xf32, #tpu.memory_space<smem>>
    %323 = vector.broadcast %322 : f32 to vector<3x128xf32>
    %324 = arith.mulf %41, %323 : vector<3x128xf32>
    %325 = arith.addf %319, %324 : vector<3x128xf32>
    %c3_i32_59 = arith.constant 3 : i32
    %326 = arith.addi %308, %c3_i32_59 : i32
    %327 = arith.index_cast %326 : i32 to index
    %328 = memref.load %arg2[%327] : memref<48xf32, #tpu.memory_space<smem>>
    %329 = vector.broadcast %328 : f32 to vector<3x128xf32>
    %330 = arith.mulf %30, %329 : vector<3x128xf32>
    %331 = arith.addf %325, %330 : vector<3x128xf32>
    %c4_i32_60 = arith.constant 4 : i32
    %332 = arith.addi %308, %c4_i32_60 : i32
    %333 = arith.index_cast %332 : i32 to index
    %334 = memref.load %arg2[%333] : memref<48xf32, #tpu.memory_space<smem>>
    %335 = vector.broadcast %334 : f32 to vector<3x128xf32>
    %336 = arith.mulf %36, %335 : vector<3x128xf32>
    %337 = arith.addf %331, %336 : vector<3x128xf32>
    %c5_i32_61 = arith.constant 5 : i32
    %338 = arith.addi %308, %c5_i32_61 : i32
    %339 = arith.index_cast %338 : i32 to index
    %340 = memref.load %arg2[%339] : memref<48xf32, #tpu.memory_space<smem>>
    %341 = vector.broadcast %340 : f32 to vector<3x128xf32>
    %342 = arith.mulf %42, %341 : vector<3x128xf32>
    %343 = arith.addf %337, %342 : vector<3x128xf32>
    %344 = arith.mulf %22, %306 : vector<3x128xf32>
    %345 = arith.subf %343, %344 : vector<3x128xf32>
    %346 = vector.broadcast %1 : f32 to vector<3x128xf32>
    %347 = arith.mulf %346, %345 : vector<3x128xf32>
    %348 = arith.addf %306, %347 : vector<3x128xf32>
    %349 = arith.mulf %303, %24 : vector<3x128xf32>
    %c6_i32_62 = arith.constant 6 : i32
    %cst_63 = arith.constant dense<0.000000e+00> : vector<3x128xf32>
    %350 = tpu.matmul %348, %3, %cst_63 {dimension_numbers = #tpu.dot_dimension_numbers<[1], [0], [0], [1], [0, 0, 1, 1], [], []>} : vector<3x128xf32>, vector<128x128xf32>, vector<3x128xf32> -> vector<3x128xf32>
    %351 = arith.addf %349, %350 : vector<3x128xf32>
    %352 = arith.addf %351, %13 : vector<3x128xf32>
    %353 = vector.broadcast %cst_10 : f32 to vector<3x128xf32>
    %354 = arith.mulf %352, %353 : vector<3x128xf32>
    %355 = vector.broadcast %cst_11 : f32 to vector<3x128xf32>
    %356 = arith.mulf %355, %354 : vector<3x128xf32>
    %357 = arith.addf %348, %356 : vector<3x128xf32>
    %c6_i32_64 = arith.constant 6 : i32
    %358 = arith.muli %c6_i32_64, %c6_i32_62 : i32
    %359 = arith.addi %43, %358 : i32
    %c0_i32_65 = arith.constant 0 : i32
    %360 = arith.addi %359, %c0_i32_65 : i32
    %361 = arith.index_cast %360 : i32 to index
    %362 = memref.load %arg2[%361] : memref<48xf32, #tpu.memory_space<smem>>
    %363 = vector.broadcast %362 : f32 to vector<3x128xf32>
    %364 = arith.mulf %29, %363 : vector<3x128xf32>
    %c1_i32_66 = arith.constant 1 : i32
    %365 = arith.addi %359, %c1_i32_66 : i32
    %366 = arith.index_cast %365 : i32 to index
    %367 = memref.load %arg2[%366] : memref<48xf32, #tpu.memory_space<smem>>
    %368 = vector.broadcast %367 : f32 to vector<3x128xf32>
    %369 = arith.mulf %35, %368 : vector<3x128xf32>
    %370 = arith.addf %364, %369 : vector<3x128xf32>
    %c2_i32_67 = arith.constant 2 : i32
    %371 = arith.addi %359, %c2_i32_67 : i32
    %372 = arith.index_cast %371 : i32 to index
    %373 = memref.load %arg2[%372] : memref<48xf32, #tpu.memory_space<smem>>
    %374 = vector.broadcast %373 : f32 to vector<3x128xf32>
    %375 = arith.mulf %41, %374 : vector<3x128xf32>
    %376 = arith.addf %370, %375 : vector<3x128xf32>
    %c3_i32_68 = arith.constant 3 : i32
    %377 = arith.addi %359, %c3_i32_68 : i32
    %378 = arith.index_cast %377 : i32 to index
    %379 = memref.load %arg2[%378] : memref<48xf32, #tpu.memory_space<smem>>
    %380 = vector.broadcast %379 : f32 to vector<3x128xf32>
    %381 = arith.mulf %30, %380 : vector<3x128xf32>
    %382 = arith.addf %376, %381 : vector<3x128xf32>
    %c4_i32_69 = arith.constant 4 : i32
    %383 = arith.addi %359, %c4_i32_69 : i32
    %384 = arith.index_cast %383 : i32 to index
    %385 = memref.load %arg2[%384] : memref<48xf32, #tpu.memory_space<smem>>
    %386 = vector.broadcast %385 : f32 to vector<3x128xf32>
    %387 = arith.mulf %36, %386 : vector<3x128xf32>
    %388 = arith.addf %382, %387 : vector<3x128xf32>
    %c5_i32_70 = arith.constant 5 : i32
    %389 = arith.addi %359, %c5_i32_70 : i32
    %390 = arith.index_cast %389 : i32 to index
    %391 = memref.load %arg2[%390] : memref<48xf32, #tpu.memory_space<smem>>
    %392 = vector.broadcast %391 : f32 to vector<3x128xf32>
    %393 = arith.mulf %42, %392 : vector<3x128xf32>
    %394 = arith.addf %388, %393 : vector<3x128xf32>
    %395 = arith.mulf %22, %357 : vector<3x128xf32>
    %396 = arith.subf %394, %395 : vector<3x128xf32>
    %397 = vector.broadcast %1 : f32 to vector<3x128xf32>
    %398 = arith.mulf %397, %396 : vector<3x128xf32>
    %399 = arith.addf %357, %398 : vector<3x128xf32>
    %400 = arith.mulf %354, %24 : vector<3x128xf32>
    %c7_i32 = arith.constant 7 : i32
    %cst_71 = arith.constant dense<0.000000e+00> : vector<3x128xf32>
    %401 = tpu.matmul %399, %3, %cst_71 {dimension_numbers = #tpu.dot_dimension_numbers<[1], [0], [0], [1], [0, 0, 1, 1], [], []>} : vector<3x128xf32>, vector<128x128xf32>, vector<3x128xf32> -> vector<3x128xf32>
    %402 = arith.addf %400, %401 : vector<3x128xf32>
    %403 = arith.addf %402, %13 : vector<3x128xf32>
    %404 = vector.broadcast %cst_10 : f32 to vector<3x128xf32>
    %405 = arith.mulf %403, %404 : vector<3x128xf32>
    %406 = vector.broadcast %cst_11 : f32 to vector<3x128xf32>
    %407 = arith.mulf %406, %405 : vector<3x128xf32>
    %408 = arith.addf %399, %407 : vector<3x128xf32>
    %c6_i32_72 = arith.constant 6 : i32
    %409 = arith.muli %c6_i32_72, %c7_i32 : i32
    %410 = arith.addi %43, %409 : i32
    %c0_i32_73 = arith.constant 0 : i32
    %411 = arith.addi %410, %c0_i32_73 : i32
    %412 = arith.index_cast %411 : i32 to index
    %413 = memref.load %arg2[%412] : memref<48xf32, #tpu.memory_space<smem>>
    %414 = vector.broadcast %413 : f32 to vector<3x128xf32>
    %415 = arith.mulf %29, %414 : vector<3x128xf32>
    %c1_i32_74 = arith.constant 1 : i32
    %416 = arith.addi %410, %c1_i32_74 : i32
    %417 = arith.index_cast %416 : i32 to index
    %418 = memref.load %arg2[%417] : memref<48xf32, #tpu.memory_space<smem>>
    %419 = vector.broadcast %418 : f32 to vector<3x128xf32>
    %420 = arith.mulf %35, %419 : vector<3x128xf32>
    %421 = arith.addf %415, %420 : vector<3x128xf32>
    %c2_i32_75 = arith.constant 2 : i32
    %422 = arith.addi %410, %c2_i32_75 : i32
    %423 = arith.index_cast %422 : i32 to index
    %424 = memref.load %arg2[%423] : memref<48xf32, #tpu.memory_space<smem>>
    %425 = vector.broadcast %424 : f32 to vector<3x128xf32>
    %426 = arith.mulf %41, %425 : vector<3x128xf32>
    %427 = arith.addf %421, %426 : vector<3x128xf32>
    %c3_i32_76 = arith.constant 3 : i32
    %428 = arith.addi %410, %c3_i32_76 : i32
    %429 = arith.index_cast %428 : i32 to index
    %430 = memref.load %arg2[%429] : memref<48xf32, #tpu.memory_space<smem>>
    %431 = vector.broadcast %430 : f32 to vector<3x128xf32>
    %432 = arith.mulf %30, %431 : vector<3x128xf32>
    %433 = arith.addf %427, %432 : vector<3x128xf32>
    %c4_i32_77 = arith.constant 4 : i32
    %434 = arith.addi %410, %c4_i32_77 : i32
    %435 = arith.index_cast %434 : i32 to index
    %436 = memref.load %arg2[%435] : memref<48xf32, #tpu.memory_space<smem>>
    %437 = vector.broadcast %436 : f32 to vector<3x128xf32>
    %438 = arith.mulf %36, %437 : vector<3x128xf32>
    %439 = arith.addf %433, %438 : vector<3x128xf32>
    %c5_i32_78 = arith.constant 5 : i32
    %440 = arith.addi %410, %c5_i32_78 : i32
    %441 = arith.index_cast %440 : i32 to index
    %442 = memref.load %arg2[%441] : memref<48xf32, #tpu.memory_space<smem>>
    %443 = vector.broadcast %442 : f32 to vector<3x128xf32>
    %444 = arith.mulf %42, %443 : vector<3x128xf32>
    %445 = arith.addf %439, %444 : vector<3x128xf32>
    %446 = arith.mulf %22, %408 : vector<3x128xf32>
    %447 = arith.subf %445, %446 : vector<3x128xf32>
    %448 = vector.broadcast %1 : f32 to vector<3x128xf32>
    %449 = arith.mulf %448, %447 : vector<3x128xf32>
    %450 = arith.addf %408, %449 : vector<3x128xf32>
    %451 = arith.mulf %405, %24 : vector<3x128xf32>
    %c8_i32 = arith.constant 8 : i32
    %c0_79 = arith.constant 0 : index
    %c0_80 = arith.constant 0 : index
    %c0_81 = arith.constant 0 : index
    %452 = vector.load %arg5[%c0_79, %c0_80, %c0_81] : memref<1x3x128xf32, #tpu.memory_space<vmem>>, vector<1x3x128xf32>
    %453 = vector.shape_cast %452 : vector<1x3x128xf32> to vector<3x128xf32>
    %454 = vector.shape_cast %450 : vector<3x128xf32> to vector<1x3x128xf32>
    tpu.vector_store %arg5[%c0_79, %c0_80, %c0_81], %454 {strides = array<i32>} : memref<1x3x128xf32, #tpu.memory_space<vmem>>, vector<1x3x128xf32>,
    return
  }
  func.func @transform_0(%arg0: i32) -> i32 {
    %c0_i32 = arith.constant 0 : i32
    %c0_i32_0 = arith.constant 0 : i32
    return %c0_i32 : i32
  }
  func.func @transform_1(%arg0: i32) -> i32 {
    %c0_i32 = arith.constant 0 : i32
    %c0_i32_0 = arith.constant 0 : i32
    return %c0_i32 : i32
  }
  func.func @transform_2(%arg0: i32) -> (i32, i32, i32) {
    %c0_i32 = arith.constant 0 : i32
    %c0_i32_0 = arith.constant 0 : i32
    %c0_i32_1 = arith.constant 0 : i32
    return %arg0, %c0_i32, %c0_i32_0 : i32, i32, i32
  }
  func.func @transform_3(%arg0: i32) -> (i32, i32, i32) {
    %c0_i32 = arith.constant 0 : i32
    %c0_i32_0 = arith.constant 0 : i32
    %c0_i32_1 = arith.constant 0 : i32
    return %arg0, %c0_i32, %c0_i32_0 : i32, i32, i32
  }
  func.func @transform_4(%arg0: i32) -> (i32, i32, i32) {
    %c0_i32 = arith.constant 0 : i32
    %c0_i32_0 = arith.constant 0 : i32
    %c0_i32_1 = arith.constant 0 : i32
    return %arg0, %c0_i32, %c0_i32_0 : i32, i32, i32
  }
}

</mosaic_0001>

<bundles_post_ra>
// kernel: sim_deform_forward.1
= control target key start
LH: loop header
LB: loop body
LE: loop exit
PB: predicated region body
PF: predicated region fallthrough
CT: control target
= control target key end

     0   :  { %10 = vsyncpa [#allocation4], 0  ;;  %s1966_s0 = inlined_call_operand.<no memory space> [shape: f32[1], index: 0, kind: input, shape index: {}]   ;;  %s1967_s1 = inlined_call_operand.vmem [shape: f32[48], index: 1, kind: input, shape index: {}]   ;;  %s1968_s2 = inlined_call_operand.vmem [shape: f32[1,3,128], index: 2, kind: input, shape index: {}]   ;;  %s1969_s3 = inlined_call_operand.vmem [shape: f32[1,128,128], index: 3, kind: input, shape index: {}]   ;;  %s1970_s4 = inlined_call_operand.vmem [shape: f32[1,3,128], index: 4, kind: output, shape index: {}]  }
   0x1   :  { %s19_s17 = sshll.u32 %s1967_s1, 4  ;;  %s20_s17 = int_to_ptr.vmem [resolvable:$true] %s19_s17 }
   0x2   :  { %s1424_s18 = scalar_lea.vmem %s20_s17, 16  ;;  %p1429_p1 = scmp.lt.s32.totalorder %s20_s17, %s20_s17 }
   0x3   :  { %p1425_p0 = scmp.ne.s32.totalorder %s20_s17, %s1424_s18  ;;  %p1430_p2 = scmp.lt.s32.totalorder %s1424_s18, %s1424_s18 }
   0x5   :  { %p1431_p3 = por %p1430_p2, %p1429_p1 }
   0x7   :  { %p1432_p4 = pnand %p1431_p3, %p1425_p0 }
   0x9   :  { %1435 = shalt.err (!%p1432_p4)
}
   0xa   :  { %s1438_s19 = smov [#allocation3]  }
   0xb   :  { %22 = dma.vmem_to_smem %s20_s17, 16, %s1438_s19, [#allocation4]  }
   0xc   :  { %1436 = dma.done.wait [#allocation4], 16  }
   0xd   :  { %1437 = vsyncadd [#allocation4], 4294967280 }
   0xe   :  { %30 = sfence }
   0xf   :  { %v1472_v0 = vld [vmem:[%s1969_s3 + $0x78] sm:$0xff]  ;;  %v1439_v1 = vmov 0.0   ;;  %v1478_v2 = vld [vmem:[%s1969_s3 + $0x70] sm:$0xff]  ;;  %vm1440_vm0 = vmmov 0   ;;  %v1488_v3 = vld [vmem:[%s1969_s3 + $0x68] sm:$0xff]  ;;  %v49_v18 = vlaneseq  ;;  %s959_s26 = sld [smem:[#allocation3 + $0x2]]  ;;  %v1698_v58 = vstv %s1966_s0 }
  0x10   :  { %1141 = vmatprep.subr.mxu0 %v1439_v1  ;;  %1173 = vmatprep.mubr.msk.f32.mxu0 %vm1440_vm0, %v1439_v1  ;;  %v1497_v4 = vld [vmem:[%s1969_s3 + $0x60] sm:$0xff]  ;;  %v1506_v5 = vld [vmem:[%s1969_s3 + $0x58] sm:$0xff]  ;;  %v1515_v6 = vld [vmem:[%s1969_s3 + $0x50] sm:$0xff]  ;;  %s960_s27 = sld [smem:[#allocation3 + $0x3]] }
  0x11   :  { %1142 = vmatpush3.msra.mxu0 %v1472_v0  ;;  %1176 = vmatprep.subr.mxu1 %v1439_v1  ;;  %v1524_v7 = vld [vmem:[%s1969_s3 + $0x48] sm:$0xff]  ;;  %v1533_v8 = vld [vmem:[%s1969_s3 + $0x40] sm:$0xff]  ;;  %v1542_v9 = vld [vmem:[%s1969_s3 + $0x38] sm:$0xff]  ;;  %v50_v19 = vshrl.u32 %v49_v18, 7  ;;  %v52_v20 = vand.u32 127, %v49_v18  ;;  %s961_s28 = sld [smem:[#allocation3 + $0x4]] }
  0x12   :  { %1143 = vmatprep.subr.mxu0 %v1439_v1  ;;  %1177 = vmatpush3.msra.mxu1 %v1472_v0  ;;  %v1551_v10 = vld [vmem:[%s1969_s3 + $0x30] sm:$0xff]  ;;  %v1560_v11 = vld [vmem:[%s1969_s3 + $0x28] sm:$0xff]  ;;  %v1569_v12 = vld [vmem:[%s1969_s3 + $0x20] sm:$0xff]  ;;  %s962_s29 = sld [smem:[#allocation3 + $0x5]] }
  0x13   :  { %1144 = vmatpush3.msra.mxu0 %v1478_v2  ;;  %1178 = vmatprep.subr.mxu1 %v1439_v1  ;;  %v1578_v13 = vld [vmem:[%s1969_s3 + $0x18] sm:$0xff]  ;;  %v1587_v14 = vld [vmem:[%s1969_s3 + $0x10] sm:$0xff]  ;;  %v1596_v15 = vld [vmem:[%s1969_s3 + $0x8] sm:$0xff]  ;;  %vm55_vm1 = vcmp.eq.s32.totalorder %v52_v20, 0  ;;  %vm63_vm2 = vcmp.eq.s32.totalorder %v50_v19, 0  ;;  %vm68_vm3 = vcmp.eq.s32.totalorder %v50_v19, 1 }
  0x14   :  { %1145 = vmatprep.subr.mxu0 %v1439_v1  ;;  %1179 = vmatpush3.msra.mxu1 %v1478_v2  ;;  %v1605_v16 = vld [vmem:[%s1969_s3] sm:$0xff]  ;;  %s958_s3 = sld [smem:[#allocation3 + $0x1]]  ;;  %v953_v21 = vsel %vm55_vm1, 1.0, %v1439_v1  ;;  %v955_v22 = vsel %vm63_vm2, 1.0, %v1439_v1  ;;  %v956_v23 = vsel %vm68_vm3, 1.0, %v1439_v1  ;;  %vm53_vm4 = vcmp.eq.s32.totalorder %v50_v19, 2 }
  0x15   :  { %1146 = vmatpush3.msra.mxu0 %v1488_v3  ;;  %1180 = vmatprep.subr.mxu1 %v1439_v1  ;;  %v1612_v17 = vld [vmem:[%s1968_s2] sm:$0x7]  ;;  %s151_s2 = sld [smem:[#allocation3]]  ;;  %v1662_v24 = vmul.f32 %v955_v22, %v953_v21  ;;  %v1664_v25 = vmul.f32 %v956_v23, %v953_v21  ;;  %v957_v26 = vsel %vm53_vm4, 1.0, %v1439_v1  ;;  %vm58_vm5 = vcmp.eq.s32.totalorder %v52_v20, 14 }
  0x16   :  { %1147 = vmatprep.subr.mxu0 %v1439_v1  ;;  %1181 = vmatpush3.msra.mxu1 %v1488_v3  ;;  %v1668_v29 = vmul.f32 %v957_v26, %v953_v21  ;;  %v954_v32 = vsel %vm58_vm5, 1.0, %v1439_v1  ;;  %v161_v33 = vstv %s959_s26  ;;  %v166_v37 = vstv %s960_s27  ;;  %s963_s0 = sld [smem:[#allocation3 + $0x6]] }
  0x17   :  { %1148 = vmatpush3.msra.mxu0 %v1497_v4  ;;  %1182 = vmatprep.subr.mxu1 %v1439_v1  ;;  %v1673_v34 = vmul.f32 %v955_v22, %v954_v32  ;;  %v1676_v38 = vmul.f32 %v956_v23, %v954_v32  ;;  %v171_v41 = vstv %s961_s28  ;;  %v1681_v42 = vsel %vm53_vm4, -0.0098, %v1439_v1  ;;  %s964_s6 = sld [smem:[#allocation3 + $0x7]] }
  0x18   :  { %1149 = vmatprep.subr.mxu0 %v1439_v1  ;;  %1183 = vmatpush3.msra.mxu1 %v1497_v4  ;;  %v162_v36 = vmul.f32 %v161_v33, %v1668_v29  ;;  %v1683_v43 = vmul.f32 %v957_v26, %v954_v32  ;;  %v176_v47 = vstv %s962_s29  ;;  %v1691_v54 = vadd.f32 %v954_v32, %v953_v21  ;;  %s965_s7 = sld [smem:[#allocation3 + $0x8]] }
  0x19   :  { %1150 = vmatpush3.msra.mxu0 %v1506_v5  ;;  %1184 = vmatprep.subr.mxu1 %v1439_v1  ;;  %v167_v40 = vmul.f32 %v166_v37, %v1673_v34  ;;  %v172_v45 = vmul.f32 %v171_v41, %v1676_v38  ;;  %s966_s8 = sld [smem:[#allocation3 + $0x9]] }
  0x1a   :  { %1151 = vmatprep.subr.mxu0 %v1439_v1  ;;  %1185 = vmatpush3.msra.mxu1 %v1506_v5  ;;  %v156_v28 = vstv %s958_s3  ;;  %v177_v52 = vmul.f32 %v176_v47, %v1683_v43  ;;  %s967_s9 = sld [smem:[#allocation3 + $0xa]]  ;;  %v1742_v23 = vsub.f32 1.0, %v1691_v54 }
  0x1b   :  { %1152 = vmatpush3.msra.mxu0 %v1515_v6  ;;  %1186 = vmatprep.subr.mxu1 %v1439_v1  ;;  %v152_v27 = vstv %s151_s2  ;;  %v157_v31 = vmul.f32 %v156_v28, %v1664_v25  ;;  %s968_s10 = sld [smem:[#allocation3 + $0xb]] }
  0x1c   :  { %1153 = vmatprep.subr.mxu0 %v1439_v1  ;;  %1187 = vmatpush3.msra.mxu1 %v1515_v6  ;;  %v153_v30 = vmul.f32 %v152_v27, %v1662_v24  ;;  %v262_v62 = vstv %s963_s0  ;;  %s969_s11 = sld [smem:[#allocation3 + $0xc]] }
  0x1d   :  { %1154 = vmatpush3.msra.mxu0 %v1524_v7  ;;  %1188 = vmatprep.subr.mxu1 %v1439_v1  ;;  %v266_v63 = vstv %s964_s6  ;;  %s970_s12 = sld [smem:[#allocation3 + $0xd]] }
  0x1e   :  { %1155 = vmatprep.subr.mxu0 %v1439_v1  ;;  %1189 = vmatpush3.msra.mxu1 %v1524_v7  ;;  %v158_v35 = vadd.f32 %v157_v31, %v153_v30  ;;  %v267_v18 = vmul.f32 %v266_v63, %v1664_v25  ;;  %v271_v19 = vstv %s965_s7  ;;  %s971_s13 = sld [smem:[#allocation3 + $0xe]] }
  0x1f   :  { %1156 = vmatpush3.msra.mxu0 %v1533_v8  ;;  %1190 = vmatprep.subr.mxu1 %v1439_v1  ;;  %v272_v21 = vmul.f32 %v271_v19, %v1668_v29  ;;  %v276_v22 = vstv %s966_s8  ;;  %s972_s14 = sld [smem:[#allocation3 + $0xf]] }
  0x20   :  { %1157 = vmatprep.subr.mxu0 %v1439_v1  ;;  %1191 = vmatpush3.msra.mxu1 %v1533_v8  ;;  %v163_v39 = vadd.f32 %v162_v36, %v158_v35  ;;  %v277_v27 = vmul.f32 %v276_v22, %v1673_v34  ;;  %v281_v28 = vstv %s967_s9  ;;  %s973_s15 = sld [smem:[#allocation3 + $0x10]] }
  0x21   :  { %1158 = vmatpush3.msra.mxu0 %v1542_v9  ;;  %1192 = vmatprep.subr.mxu1 %v1439_v1  ;;  %v282_v35 = vmul.f32 %v281_v28, %v1676_v38  ;;  %v286_v36 = vstv %s968_s10  ;;  %s974_s16 = sld [smem:[#allocation3 + $0x11]] }
  0x22   :  { %1159 = vmatprep.subr.mxu0 %v1439_v1  ;;  %1193 = vmatpush3.msra.mxu1 %v1542_v9  ;;  %v168_v44 = vadd.f32 %v167_v40, %v163_v39  ;;  %s975_s17 = sld [smem:[#allocation3 + $0x12]] }
  0x23   :  { %1160 = vmatpush3.msra.mxu0 %v1551_v10  ;;  %1194 = vmatprep.subr.mxu1 %v1439_v1  ;;  %s976_s18 = sld [smem:[#allocation3 + $0x13]] }
  0x24   :  { %1161 = vmatprep.subr.mxu0 %v1439_v1  ;;  %1195 = vmatpush3.msra.mxu1 %v1551_v10  ;;  %v173_v51 = vadd.f32 %v172_v45, %v168_v44  ;;  %v287_v44 = vmul.f32 %v286_v36, %v1683_v43  ;;  %s977_s19 = sld [smem:[#allocation3 + $0x14]] }
  0x25   :  { %1162 = vmatpush3.msra.mxu0 %v1560_v11  ;;  %1196 = vmatprep.subr.mxu1 %v1439_v1  ;;  %s978_s20 = sld [smem:[#allocation3 + $0x15]] }
  0x26   :  { %1163 = vmatprep.subr.mxu0 %v1439_v1  ;;  %1197 = vmatpush3.msra.mxu1 %v1560_v11  ;;  %v178_v56 = vadd.f32 %v177_v52, %v173_v51  ;;  %v371_v52 = vstv %s969_s11  ;;  %s979_s21 = sld [smem:[#allocation3 + $0x16]] }
  0x27   :  { %1164 = vmatpush3.msra.mxu0 %v1569_v12  ;;  %1198 = vmatprep.subr.mxu1 %v1439_v1  ;;  %s980_s1 = sld [smem:[#allocation3 + $0x17]] }
  0x28   :  { %1165 = vmatprep.subr.mxu0 %v1439_v1  ;;  %1199 = vmatpush3.msra.mxu1 %v1569_v12  ;;  %s981_s22 = sld [smem:[#allocation3 + $0x18]] }
  0x29   :  { %1166 = vmatpush3.msra.mxu0 %v1578_v13  ;;  %1200 = vmatprep.subr.mxu1 %v1439_v1  ;;  %s982_s23 = sld [smem:[#allocation3 + $0x19]] }
  0x2a   :  { %1167 = vmatprep.subr.mxu0 %v1439_v1  ;;  %1201 = vmatpush3.msra.mxu1 %v1578_v13  ;;  %s983_s24 = sld [smem:[#allocation3 + $0x1a]] }
  0x2b   :  { %1168 = vmatpush3.msra.mxu0 %v1587_v14  ;;  %1202 = vmatprep.subr.mxu1 %v1439_v1  ;;  %s984_s25 = sld [smem:[#allocation3 + $0x1b]] }
  0x2c   :  { %1169 = vmatprep.subr.mxu0 %v1439_v1  ;;  %1203 = vmatpush3.msra.mxu1 %v1587_v14  ;;  %s985_s2 = sld [smem:[#allocation3 + $0x1c]] }
  0x2d   :  { %1170 = vmatpush3.msra.mxu0 %v1596_v15  ;;  %1204 = vmatprep.subr.mxu1 %v1439_v1  ;;  %s986_s3 = sld [smem:[#allocation3 + $0x1d]] }
  0x2e   :  { %1171 = vmatprep.subr.mxu0 %v1439_v1  ;;  %1205 = vmatpush3.msra.mxu1 %v1596_v15  ;;  %s987_s26 = sld [smem:[#allocation3 + $0x1e]] }
  0x2f   :  { %1172 = vmatpush3.msra.mxu0 %v1605_v16  ;;  %1206 = vmatprep.subr.mxu1 %v1439_v1  ;;  %s988_s27 = sld [smem:[#allocation3 + $0x1f]] }
  0x30   :  { %1174 = vmatmul.mubr.f32.vlgmr.msra.gmra.mxu0 %v1612_v17  ;;  %1207 = vmatpush3.msra.mxu1 %v1605_v16  ;;  %s989_s28 = sld [smem:[#allocation3 + $0x20]] }
  0x31   :  { %1208 = vmatprep.mubr.msk.f32.mxu1 %vm1440_vm0, %v1439_v1  ;;  %1211 = vmatprep.subr.mxu0 %v1439_v1  ;;  %s990_s29 = sld [smem:[#allocation3 + $0x21]] }
  0x32   :  { %1212 = vmatpush3.msra.mxu0 %v1472_v0  ;;  %1243 = vmatprep.mubr.msk.f32.mxu0 %vm1440_vm0, %v1439_v1  ;;  %s991_s30 = sld [smem:[#allocation3 + $0x22]] }
  0x33   :  { %1213 = vmatprep.subr.mxu0 %v1439_v1  ;;  %1246 = vmatprep.subr.mxu1 %v1439_v1  ;;  %s992_s5 = sld [smem:[#allocation3 + $0x23]] }
  0x34   :  { %1214 = vmatpush3.msra.mxu0 %v1478_v2  ;;  %s993_s0 = sld [smem:[#allocation3 + $0x24]] }
  0x35   :  { %1215 = vmatprep.subr.mxu0 %v1439_v1  ;;  %s994_s6 = sld [smem:[#allocation3 + $0x25]] }
  0x36   :  { %1216 = vmatpush3.msra.mxu0 %v1488_v3  ;;  %s995_s7 = sld [smem:[#allocation3 + $0x26]] }
  0x37   :  { %1217 = vmatprep.subr.mxu0 %v1439_v1  ;;  %s996_s8 = sld [smem:[#allocation3 + $0x27]] }
  0x38   :  { %1218 = vmatpush3.msra.mxu0 %v1497_v4  ;;  %s997_s9 = sld [smem:[#allocation3 + $0x28]] }
  0x39   :  { %1219 = vmatprep.subr.mxu0 %v1439_v1  ;;  %s998_s10 = sld [smem:[#allocation3 + $0x29]] }
  0x3a   :  { %1220 = vmatpush3.msra.mxu0 %v1506_v5  ;;  %s999_s11 = sld [smem:[#allocation3 + $0x2a]] }
  0x3b   :  { %1221 = vmatprep.subr.mxu0 %v1439_v1 }
  0x3c   :  { %1222 = vmatpush3.msra.mxu0 %v1515_v6 }
  0x3d   :  { %1223 = vmatprep.subr.mxu0 %v1439_v1 }
  0x3e   :  { %1224 = vmatpush3.msra.mxu0 %v1524_v7 }
  0x3f   :  { %1225 = vmatprep.subr.mxu0 %v1439_v1 }
  0x40   :  { %1226 = vmatpush3.msra.mxu0 %v1533_v8 }
  0x41   :  { %1227 = vmatprep.subr.mxu0 %v1439_v1 }
  0x42   :  { %1228 = vmatpush3.msra.mxu0 %v1542_v9 }
  0x43   :  { %1229 = vmatprep.subr.mxu0 %v1439_v1 }
  0x44   :  { %1230 = vmatpush3.msra.mxu0 %v1551_v10 }
  0x45   :  { %1231 = vmatprep.subr.mxu0 %v1439_v1 }
  0x46   :  { %1232 = vmatpush3.msra.mxu0 %v1560_v11 }
  0x47   :  { %1233 = vmatprep.subr.mxu0 %v1439_v1 }
  0x48   :  { %1234 = vmatpush3.msra.mxu0 %v1569_v12 }
  0x49   :  { %1235 = vmatprep.subr.mxu0 %v1439_v1 }
  0x4a   :  { %1236 = vmatpush3.msra.mxu0 %v1578_v13 }
  0x4b   :  { %1237 = vmatprep.subr.mxu0 %v1439_v1 }
  0x4c   :  { %1238 = vmatpush3.msra.mxu0 %v1587_v14 }
  0x4d   :  { %1239 = vmatprep.subr.mxu0 %v1439_v1 }
  0x4e   :  { %1240 = vmatpush3.msra.mxu0 %v1596_v15 }
  0x4f   :  { %1241 = vmatprep.subr.mxu0 %v1439_v1 }
  0x50   :  { %1242 = vmatpush3.msra.mxu0 %v1605_v16 }
  0x51   :  { %1281 = vmatprep.subr.mxu0 %v1439_v1 }
  0xf0   :  { %v144_v46 = vpop.f32.mrf.mxu0 }
  0xf1   :  { %v145_v48 = vadd.f32 %v144_v46, %v1681_v42 }
  0xf2   :  { %v1175_v49 = vpop.f32.mrf.mxu0 }
  0xf3   :  { %v1687_v50 = vmul.f32 0.995, %v145_v48 }
  0xf5   :  { %v149_v53 = vmul.f32 0.001, %v1687_v50  ;;  %v184_v30 = vmul.f32 %v1687_v50, %v1742_v23 }
  0xf7   :  { %v150_v55 = vadd.f32 %v149_v53, %v1612_v17  ;;  %v263_v17 = vmul.f32 %v262_v62, %v1662_v24  ;;  %v375_v53 = vstv %s970_s12  ;;  %s1000_s12 = sld [smem:[#allocation3 + $0x2b]] }
  0xf9   :  { %v179_v57 = vmul.f32 %v150_v55, %v1691_v54  ;;  %v268_v20 = vadd.f32 %v267_v18, %v263_v17  ;;  %v390_v17 = vstv %s973_s15  ;;  %s1003_s15 = sld [smem:[#allocation3 + $0x2e]] }
  0xfa   :  { %v391_v22 = vmul.f32 %v390_v17, %v1676_v38 }
  0xfb   :  { %v180_v59 = vsub.f32 %v178_v56, %v179_v57  ;;  %v273_v26 = vadd.f32 %v272_v21, %v268_v20  ;;  %v376_v56 = vmul.f32 %v375_v53, %v1664_v25  ;;  %v380_v57 = vstv %s971_s13  ;;  %s1001_s13 = sld [smem:[#allocation3 + $0x2c]] }
  0xfd   :  { %v182_v60 = vmul.f32 %v1698_v58, %v180_v59  ;;  %v278_v33 = vadd.f32 %v277_v27, %v273_v26  ;;  %v395_v26 = vstv %s974_s16  ;;  %s1004_s16 = sld [smem:[#allocation3 + $0x2f]] }
  0xff   :  { %v1701_v61 = vadd.f32 %v182_v60, %v150_v55  ;;  %v283_v41 = vadd.f32 %v282_v35, %v278_v33  ;;  %v372_v55 = vmul.f32 %v371_v52, %v1662_v24  ;;  %v381_v60 = vmul.f32 %v380_v57, %v1668_v29 }
 0x101   :  { %1209 = vmatmul.mubr.f32.vlgmr.msra.gmra.mxu1 %v1701_v61  ;;  %v288_v47 = vadd.f32 %v287_v44, %v283_v41  ;;  %v377_v59 = vadd.f32 %v376_v56, %v372_v55  ;;  %v480_v44 = vstv %s975_s17  ;;  %v499_v55 = vstv %s979_s21 }
 0x102   :  { %1247 = vmatpush3.msra.mxu1 %v1472_v0  ;;  %1278 = vmatprep.mubr.msk.f32.mxu1 %vm1440_vm0, %v1439_v1 }
 0x103   :  { %1248 = vmatprep.subr.mxu1 %v1439_v1  ;;  %v382_v62 = vadd.f32 %v381_v60, %v377_v59 }
 0x104   :  { %1249 = vmatpush3.msra.mxu1 %v1478_v2 }
 0x105   :  { %1250 = vmatprep.subr.mxu1 %v1439_v1 }
 0x106   :  { %1251 = vmatpush3.msra.mxu1 %v1488_v3 }
 0x107   :  { %1252 = vmatprep.subr.mxu1 %v1439_v1 }
 0x108   :  { %1253 = vmatpush3.msra.mxu1 %v1497_v4 }
 0x109   :  { %1254 = vmatprep.subr.mxu1 %v1439_v1 }
 0x10a   :  { %1255 = vmatpush3.msra.mxu1 %v1506_v5 }
 0x10b   :  { %1256 = vmatprep.subr.mxu1 %v1439_v1 }
 0x10c   :  { %1257 = vmatpush3.msra.mxu1 %v1515_v6 }
 0x10d   :  { %1258 = vmatprep.subr.mxu1 %v1439_v1 }
 0x10e   :  { %1259 = vmatpush3.msra.mxu1 %v1524_v7 }
 0x10f   :  { %1260 = vmatprep.subr.mxu1 %v1439_v1 }
 0x110   :  { %1261 = vmatpush3.msra.mxu1 %v1533_v8 }
 0x111   :  { %1262 = vmatprep.subr.mxu1 %v1439_v1 }
 0x112   :  { %1263 = vmatpush3.msra.mxu1 %v1542_v9 }
 0x113   :  { %1264 = vmatprep.subr.mxu1 %v1439_v1 }
 0x114   :  { %1265 = vmatpush3.msra.mxu1 %v1551_v10 }
 0x115   :  { %1266 = vmatprep.subr.mxu1 %v1439_v1 }
 0x116   :  { %1267 = vmatpush3.msra.mxu1 %v1560_v11 }
 0x117   :  { %1268 = vmatprep.subr.mxu1 %v1439_v1 }
 0x118   :  { %1269 = vmatpush3.msra.mxu1 %v1569_v12 }
 0x119   :  { %1270 = vmatprep.subr.mxu1 %v1439_v1 }
 0x11a   :  { %1271 = vmatpush3.msra.mxu1 %v1578_v13 }
 0x11b   :  { %1272 = vmatprep.subr.mxu1 %v1439_v1 }
 0x11c   :  { %1273 = vmatpush3.msra.mxu1 %v1587_v14 }
 0x11d   :  { %1274 = vmatprep.subr.mxu1 %v1439_v1 }
 0x11e   :  { %1275 = vmatpush3.msra.mxu1 %v1596_v15 }
 0x11f   :  { %1276 = vmatprep.subr.mxu1 %v1439_v1 }
 0x120   :  { %1277 = vmatpush3.msra.mxu1 %v1605_v16 }
 0x121   :  { %1316 = vmatprep.subr.mxu1 %v1439_v1 }
 0x1c1   :  { %v251_v31 = vpop.f32.mrf.mxu1 }
 0x1c2   :  { %v255_v32 = vadd.f32 %v251_v31, %v184_v30 }
 0x1c3   :  { %v1210_v37 = vpop.f32.mrf.mxu1 }
 0x1c4   :  { %v256_v39 = vadd.f32 %v255_v32, %v1681_v42  ;;  %v396_v32 = vmul.f32 %v395_v26, %v1683_v43 }
 0x1c6   :  { %v257_v40 = vmul.f32 0.995, %v256_v39 }
 0x1c8   :  { %v258_v45 = vmul.f32 0.001, %v257_v40  ;;  %v293_v18 = vmul.f32 %v257_v40, %v1742_v23 }
 0x1ca   :  { %v259_v46 = vadd.f32 %v258_v45, %v1701_v61  ;;  %v385_v61 = vstv %s972_s14  ;;  %v484_v45 = vstv %s976_s18  ;;  %s1002_s14 = sld [smem:[#allocation3 + $0x2d]] }
 0x1cb   :  { %v386_v63 = vmul.f32 %v385_v61, %v1673_v34  ;;  %v500_v61 = vmul.f32 %v499_v55, %v1676_v38 }
 0x1cc   :  { %v289_v48 = vmul.f32 %v259_v46, %v1691_v54 }
 0x1cd   :  { %v387_v21 = vadd.f32 %v386_v63, %v382_v62  ;;  %v504_v62 = vstv %s980_s1 }
 0x1ce   :  { %v290_v49 = vsub.f32 %v288_v47, %v289_v48  ;;  %v485_v47 = vmul.f32 %v484_v45, %v1664_v25  ;;  %v489_v48 = vstv %s977_s19 }
 0x1cf   :  { %v392_v31 = vadd.f32 %v391_v22, %v387_v21 }
 0x1d0   :  { %v291_v50 = vmul.f32 %v290_v49, %v1698_v58 }
 0x1d1   :  { %v397_v36 = vadd.f32 %v396_v32, %v392_v31  ;;  %v589_v32 = vstv %s981_s22 }
 0x1d2   :  { %v1753_v51 = vadd.f32 %v291_v50, %v259_v46  ;;  %v481_v46 = vmul.f32 %v480_v44, %v1662_v24  ;;  %v490_v50 = vmul.f32 %v489_v48, %v1668_v29 }
 0x1d4   :  { %1244 = vmatmul.mubr.f32.vlgmr.msra.gmra.mxu0 %v1753_v51  ;;  %v486_v49 = vadd.f32 %v485_v47, %v481_v46  ;;  %v608_v46 = vstv %s985_s2 }
 0x1d5   :  { %1282 = vmatpush3.msra.mxu0 %v1472_v0  ;;  %1313 = vmatprep.mubr.msk.f32.mxu0 %vm1440_vm0, %v1439_v1 }
 0x1d6   :  { %1283 = vmatprep.subr.mxu0 %v1439_v1  ;;  %v491_v52 = vadd.f32 %v490_v50, %v486_v49 }
 0x1d7   :  { %1284 = vmatpush3.msra.mxu0 %v1478_v2 }
 0x1d8   :  { %1285 = vmatprep.subr.mxu0 %v1439_v1 }
 0x1d9   :  { %1286 = vmatpush3.msra.mxu0 %v1488_v3 }
 0x1da   :  { %1287 = vmatprep.subr.mxu0 %v1439_v1 }
 0x1db   :  { %1288 = vmatpush3.msra.mxu0 %v1497_v4 }
 0x1dc   :  { %1289 = vmatprep.subr.mxu0 %v1439_v1 }
 0x1dd   :  { %1290 = vmatpush3.msra.mxu0 %v1506_v5 }
 0x1de   :  { %1291 = vmatprep.subr.mxu0 %v1439_v1 }
 0x1df   :  { %1292 = vmatpush3.msra.mxu0 %v1515_v6 }
 0x1e0   :  { %1293 = vmatprep.subr.mxu0 %v1439_v1 }
 0x1e1   :  { %1294 = vmatpush3.msra.mxu0 %v1524_v7 }
 0x1e2   :  { %1295 = vmatprep.subr.mxu0 %v1439_v1 }
 0x1e3   :  { %1296 = vmatpush3.msra.mxu0 %v1533_v8 }
 0x1e4   :  { %1297 = vmatprep.subr.mxu0 %v1439_v1 }
 0x1e5   :  { %1298 = vmatpush3.msra.mxu0 %v1542_v9 }
 0x1e6   :  { %1299 = vmatprep.subr.mxu0 %v1439_v1 }
 0x1e7   :  { %1300 = vmatpush3.msra.mxu0 %v1551_v10 }
 0x1e8   :  { %1301 = vmatprep.subr.mxu0 %v1439_v1 }
 0x1e9   :  { %1302 = vmatpush3.msra.mxu0 %v1560_v11 }
 0x1ea   :  { %1303 = vmatprep.subr.mxu0 %v1439_v1 }
 0x1eb   :  { %1304 = vmatpush3.msra.mxu0 %v1569_v12 }
 0x1ec   :  { %1305 = vmatprep.subr.mxu0 %v1439_v1 }
 0x1ed   :  { %1306 = vmatpush3.msra.mxu0 %v1578_v13 }
 0x1ee   :  { %1307 = vmatprep.subr.mxu0 %v1439_v1 }
 0x1ef   :  { %1308 = vmatpush3.msra.mxu0 %v1587_v14 }
 0x1f0   :  { %1309 = vmatprep.subr.mxu0 %v1439_v1 }
 0x1f1   :  { %1310 = vmatpush3.msra.mxu0 %v1596_v15 }
 0x1f2   :  { %1311 = vmatprep.subr.mxu0 %v1439_v1 }
 0x1f3   :  { %1312 = vmatpush3.msra.mxu0 %v1605_v16 }
 0x1f4   :  { %1351 = vmatprep.subr.mxu0 %v1439_v1 }
 0x294   :  { %v360_v19 = vpop.f32.mrf.mxu0 }
 0x295   :  { %v364_v20 = vadd.f32 %v360_v19, %v293_v18 }
 0x296   :  { %v1245_v27 = vpop.f32.mrf.mxu0 }
 0x297   :  { %v365_v28 = vadd.f32 %v364_v20, %v1681_v42  ;;  %v505_v20 = vmul.f32 %v504_v62, %v1683_v43 }
 0x299   :  { %v366_v30 = vmul.f32 0.995, %v365_v28 }
 0x29b   :  { %v367_v33 = vmul.f32 0.001, %v366_v30  ;;  %v402_v56 = vmul.f32 %v366_v30, %v1742_v23 }
 0x29d   :  { %v368_v35 = vadd.f32 %v367_v33, %v1753_v51  ;;  %v494_v51 = vstv %s978_s20  ;;  %v593_v33 = vstv %s982_s23 }
 0x29e   :  { %v495_v53 = vmul.f32 %v494_v51, %v1673_v34  ;;  %v609_v51 = vmul.f32 %v608_v46, %v1676_v38 }
 0x29f   :  { %v398_v37 = vmul.f32 %v368_v35, %v1691_v54 }
 0x2a0   :  { %v496_v60 = vadd.f32 %v495_v53, %v491_v52  ;;  %v613_v52 = vstv %s986_s3 }
 0x2a1   :  { %v399_v39 = vsub.f32 %v397_v36, %v398_v37  ;;  %v594_v36 = vmul.f32 %v593_v33, %v1664_v25  ;;  %v598_v37 = vstv %s983_s24 }
 0x2a2   :  { %v501_v19 = vadd.f32 %v500_v61, %v496_v60 }
 0x2a3   :  { %v400_v40 = vmul.f32 %v399_v39, %v1698_v58 }
 0x2a4   :  { %v506_v26 = vadd.f32 %v505_v20, %v501_v19 }
 0x2a5   :  { %v1801_v41 = vadd.f32 %v400_v40, %v368_v35  ;;  %v590_v35 = vmul.f32 %v589_v32, %v1662_v24  ;;  %v599_v40 = vmul.f32 %v598_v37, %v1668_v29  ;;  %v807_v37 = vstv %s993_s0 }
 0x2a7   :  { %1279 = vmatmul.mubr.f32.vlgmr.msra.gmra.mxu1 %v1801_v41  ;;  %v595_v39 = vadd.f32 %v594_v36, %v590_v35 }
 0x2a8   :  { %1317 = vmatpush3.msra.mxu1 %v1472_v0  ;;  %1348 = vmatprep.mubr.msk.f32.mxu1 %vm1440_vm0, %v1439_v1 }
 0x2a9   :  { %1318 = vmatprep.subr.mxu1 %v1439_v1  ;;  %v600_v44 = vadd.f32 %v599_v40, %v595_v39  ;;  %v811_v39 = vstv %s994_s6  ;;  %v808_v40 = vmul.f32 %v807_v37, %v1662_v24 }
 0x2aa   :  { %1319 = vmatpush3.msra.mxu1 %v1478_v2 }
 0x2ab   :  { %1320 = vmatprep.subr.mxu1 %v1439_v1 }
 0x2ac   :  { %1321 = vmatpush3.msra.mxu1 %v1488_v3 }
 0x2ad   :  { %1322 = vmatprep.subr.mxu1 %v1439_v1 }
 0x2ae   :  { %1323 = vmatpush3.msra.mxu1 %v1497_v4 }
 0x2af   :  { %1324 = vmatprep.subr.mxu1 %v1439_v1 }
 0x2b0   :  { %1325 = vmatpush3.msra.mxu1 %v1506_v5 }
 0x2b1   :  { %1326 = vmatprep.subr.mxu1 %v1439_v1 }
 0x2b2   :  { %1327 = vmatpush3.msra.mxu1 %v1515_v6 }
 0x2b3   :  { %1328 = vmatprep.subr.mxu1 %v1439_v1 }
 0x2b4   :  { %1329 = vmatpush3.msra.mxu1 %v1524_v7 }
 0x2b5   :  { %1330 = vmatprep.subr.mxu1 %v1439_v1 }
 0x2b6   :  { %1331 = vmatpush3.msra.mxu1 %v1533_v8 }
 0x2b7   :  { %1332 = vmatprep.subr.mxu1 %v1439_v1 }
 0x2b8   :  { %1333 = vmatpush3.msra.mxu1 %v1542_v9 }
 0x2b9   :  { %1334 = vmatprep.subr.mxu1 %v1439_v1 }
 0x2ba   :  { %1335 = vmatpush3.msra.mxu1 %v1551_v10 }
 0x2bb   :  { %1336 = vmatprep.subr.mxu1 %v1439_v1 }
 0x2bc   :  { %1337 = vmatpush3.msra.mxu1 %v1560_v11 }
 0x2bd   :  { %1338 = vmatprep.subr.mxu1 %v1439_v1 }
 0x2be   :  { %1339 = vmatpush3.msra.mxu1 %v1569_v12 }
 0x2bf   :  { %1340 = vmatprep.subr.mxu1 %v1439_v1 }
 0x2c0   :  { %1341 = vmatpush3.msra.mxu1 %v1578_v13 }
 0x2c1   :  { %1342 = vmatprep.subr.mxu1 %v1439_v1 }
 0x2c2   :  { %1343 = vmatpush3.msra.mxu1 %v1587_v14 }
 0x2c3   :  { %1344 = vmatprep.subr.mxu1 %v1439_v1 }
 0x2c4   :  { %1345 = vmatpush3.msra.mxu1 %v1596_v15 }
 0x2c5   :  { %1346 = vmatprep.subr.mxu1 %v1439_v1 }
 0x2c6   :  { %1347 = vmatpush3.msra.mxu1 %v1605_v16 }
 0x2c7   :  { %1386 = vmatprep.subr.mxu1 %v1439_v1 }
 0x367   :  { %v469_v57 = vpop.f32.mrf.mxu1 }
 0x368   :  { %v473_v59 = vadd.f32 %v469_v57, %v402_v56 }
 0x369   :  { %v1280_v63 = vpop.f32.mrf.mxu1 }
 0x36a   :  { %v474_v17 = vadd.f32 %v473_v59, %v1681_v42  ;;  %v614_v59 = vmul.f32 %v613_v52, %v1683_v43 }
 0x36c   :  { %v475_v18 = vmul.f32 0.995, %v474_v17 }
 0x36e   :  { %v476_v21 = vmul.f32 0.001, %v475_v18  ;;  %v511_v47 = vmul.f32 %v475_v18, %v1742_v23 }
 0x370   :  { %v477_v22 = vadd.f32 %v476_v21, %v1801_v41  ;;  %v603_v41 = vstv %s984_s25 }
 0x371   :  { %v604_v45 = vmul.f32 %v603_v41, %v1673_v34  ;;  %v812_v41 = vmul.f32 %v811_v39, %v1664_v25 }
 0x372   :  { %v507_v27 = vmul.f32 %v477_v22, %v1691_v54 }
 0x373   :  { %v605_v50 = vadd.f32 %v604_v45, %v600_v44  ;;  %v816_v44 = vstv %s995_s7  ;;  %v813_v45 = vadd.f32 %v812_v41, %v808_v40 }
 0x374   :  { %v508_v28 = vsub.f32 %v506_v26, %v507_v27  ;;  %v817_v46 = vmul.f32 %v816_v44, %v1668_v29 }
 0x375   :  { %v610_v57 = vadd.f32 %v609_v51, %v605_v50  ;;  %v826_v50 = vstv %s997_s9 }
 0x376   :  { %v509_v30 = vmul.f32 %v508_v28, %v1698_v58 }
 0x377   :  { %v615_v62 = vadd.f32 %v614_v59, %v610_v57  ;;  %v831_v57 = vstv %s998_s10 }
 0x378   :  { %v1849_v31 = vadd.f32 %v509_v30, %v477_v22 }
 0x37a   :  { %1314 = vmatmul.mubr.f32.vlgmr.msra.gmra.mxu0 %v1849_v31 }
 0x37b   :  { %1352 = vmatpush3.msra.mxu0 %v1472_v0  ;;  %1383 = vmatprep.mubr.msk.f32.mxu0 %vm1440_vm0, %v1439_v1 }
 0x37c   :  { %1353 = vmatprep.subr.mxu0 %v1439_v1 }
 0x37d   :  { %1354 = vmatpush3.msra.mxu0 %v1478_v2 }
 0x37e   :  { %1355 = vmatprep.subr.mxu0 %v1439_v1 }
 0x37f   :  { %1356 = vmatpush3.msra.mxu0 %v1488_v3 }
 0x380   :  { %1357 = vmatprep.subr.mxu0 %v1439_v1 }
 0x381   :  { %1358 = vmatpush3.msra.mxu0 %v1497_v4 }
 0x382   :  { %1359 = vmatprep.subr.mxu0 %v1439_v1 }
 0x383   :  { %1360 = vmatpush3.msra.mxu0 %v1506_v5 }
 0x384   :  { %1361 = vmatprep.subr.mxu0 %v1439_v1 }
 0x385   :  { %1362 = vmatpush3.msra.mxu0 %v1515_v6 }
 0x386   :  { %1363 = vmatprep.subr.mxu0 %v1439_v1 }
 0x387   :  { %1364 = vmatpush3.msra.mxu0 %v1524_v7 }
 0x388   :  { %1365 = vmatprep.subr.mxu0 %v1439_v1 }
 0x389   :  { %1366 = vmatpush3.msra.mxu0 %v1533_v8 }
 0x38a   :  { %1367 = vmatprep.subr.mxu0 %v1439_v1 }
 0x38b   :  { %1368 = vmatpush3.msra.mxu0 %v1542_v9 }
 0x38c   :  { %1369 = vmatprep.subr.mxu0 %v1439_v1 }
 0x38d   :  { %1370 = vmatpush3.msra.mxu0 %v1551_v10 }
 0x38e   :  { %1371 = vmatprep.subr.mxu0 %v1439_v1 }
 0x38f   :  { %1372 = vmatpush3.msra.mxu0 %v1560_v11 }
 0x390   :  { %1373 = vmatprep.subr.mxu0 %v1439_v1 }
 0x391   :  { %1374 = vmatpush3.msra.mxu0 %v1569_v12 }
 0x392   :  { %1375 = vmatprep.subr.mxu0 %v1439_v1 }
 0x393   :  { %1376 = vmatpush3.msra.mxu0 %v1578_v13 }
 0x394   :  { %1377 = vmatprep.subr.mxu0 %v1439_v1 }
 0x395   :  { %1378 = vmatpush3.msra.mxu0 %v1587_v14 }
 0x396   :  { %1379 = vmatprep.subr.mxu0 %v1439_v1 }
 0x397   :  { %1380 = vmatpush3.msra.mxu0 %v1596_v15 }
 0x398   :  { %1381 = vmatprep.subr.mxu0 %v1439_v1 }
 0x399   :  { %1382 = vmatpush3.msra.mxu0 %v1605_v16 }
 0x43a   :  { %v578_v48 = vpop.f32.mrf.mxu0 }
 0x43b   :  { %v582_v49 = vadd.f32 %v578_v48, %v511_v47  ;;  %v821_v47 = vstv %s996_s8  ;;  %v818_v48 = vadd.f32 %v817_v46, %v813_v45 }
 0x43c   :  { %v1315_v53 = vpop.f32.mrf.mxu0 }
 0x43d   :  { %v583_v55 = vadd.f32 %v582_v49, %v1681_v42  ;;  %v822_v49 = vmul.f32 %v821_v47, %v1673_v34 }
 0x43f   :  { %v584_v56 = vmul.f32 0.995, %v583_v55  ;;  %v823_v55 = vadd.f32 %v822_v49, %v818_v48 }
 0x441   :  { %v585_v60 = vmul.f32 0.001, %v584_v56 }
 0x443   :  { %v586_v61 = vadd.f32 %v585_v60, %v1849_v31 }
 0x445   :  { %v616_v63 = vmul.f32 %v586_v61, %v1691_v54 }
 0x447   :  { %v617_v17 = vsub.f32 %v615_v62, %v616_v63  ;;  %v832_v63 = vmul.f32 %v831_v57, %v1683_v43 }
 0x449   :  { %v618_v18 = vmul.f32 %v617_v17, %v1698_v58 }
 0x44b   :  { %v1896_v19 = vadd.f32 %v618_v18, %v586_v61 }
 0x44d   :  { %1349 = vmatmul.mubr.f32.vlgmr.msra.gmra.mxu1 %v1896_v19 }
 0x44e   :  { %1387 = vmatpush3.msra.mxu1 %v1472_v0  ;;  %1418 = vmatprep.mubr.msk.f32.mxu1 %vm1440_vm0, %v1439_v1  ;;  %v698_v0 = vstv %s987_s26 }
 0x44f   :  { %1388 = vmatprep.subr.mxu1 %v1439_v1 }
 0x450   :  { %1389 = vmatpush3.msra.mxu1 %v1478_v2  ;;  %v702_v2 = vstv %s988_s27 }
 0x451   :  { %1390 = vmatprep.subr.mxu1 %v1439_v1 }
 0x452   :  { %1391 = vmatpush3.msra.mxu1 %v1488_v3  ;;  %v699_v3 = vmul.f32 %v698_v0, %v1662_v24 }
 0x453   :  { %1392 = vmatprep.subr.mxu1 %v1439_v1 }
 0x454   :  { %1393 = vmatpush3.msra.mxu1 %v1497_v4  ;;  %v703_v4 = vmul.f32 %v702_v2, %v1664_v25 }
 0x455   :  { %1394 = vmatprep.subr.mxu1 %v1439_v1 }
 0x456   :  { %1395 = vmatpush3.msra.mxu1 %v1506_v5  ;;  %v707_v5 = vstv %s989_s28 }
 0x457   :  { %1396 = vmatprep.subr.mxu1 %v1439_v1 }
 0x458   :  { %1397 = vmatpush3.msra.mxu1 %v1515_v6  ;;  %v704_v6 = vadd.f32 %v703_v4, %v699_v3 }
 0x459   :  { %1398 = vmatprep.subr.mxu1 %v1439_v1 }
 0x45a   :  { %1399 = vmatpush3.msra.mxu1 %v1524_v7  ;;  %v708_v7 = vmul.f32 %v707_v5, %v1668_v29  ;;  %v916_v5 = vstv %s999_s11 }
 0x45b   :  { %1400 = vmatprep.subr.mxu1 %v1439_v1 }
 0x45c   :  { %1401 = vmatpush3.msra.mxu1 %v1533_v8  ;;  %v712_v8 = vstv %s990_s29 }
 0x45d   :  { %1402 = vmatprep.subr.mxu1 %v1439_v1 }
 0x45e   :  { %1403 = vmatpush3.msra.mxu1 %v1542_v9  ;;  %v713_v9 = vmul.f32 %v712_v8, %v1673_v34 }
 0x45f   :  { %1404 = vmatprep.subr.mxu1 %v1439_v1 }
 0x460   :  { %1405 = vmatpush3.msra.mxu1 %v1551_v10  ;;  %v717_v10 = vstv %s991_s30 }
 0x461   :  { %1406 = vmatprep.subr.mxu1 %v1439_v1 }
 0x462   :  { %1407 = vmatpush3.msra.mxu1 %v1560_v11  ;;  %v620_v11 = vmul.f32 %v584_v56, %v1742_v23  ;;  %v827_v56 = vmul.f32 %v826_v50, %v1676_v38 }
 0x463   :  { %1408 = vmatprep.subr.mxu1 %v1439_v1 }
 0x464   :  { %1409 = vmatpush3.msra.mxu1 %v1569_v12  ;;  %v828_v62 = vadd.f32 %v827_v56, %v823_v55 }
 0x465   :  { %1410 = vmatprep.subr.mxu1 %v1439_v1 }
 0x466   :  { %1411 = vmatpush3.msra.mxu1 %v1578_v13 }
 0x467   :  { %1412 = vmatprep.subr.mxu1 %v1439_v1 }
 0x468   :  { %1413 = vmatpush3.msra.mxu1 %v1587_v14 }
 0x469   :  { %1414 = vmatprep.subr.mxu1 %v1439_v1 }
 0x46a   :  { %1415 = vmatpush3.msra.mxu1 %v1596_v15  ;;  %v718_v15 = vmul.f32 %v717_v10, %v1676_v38 }
 0x46b   :  { %1416 = vmatprep.subr.mxu1 %v1439_v1  ;;  %v709_v1 = vadd.f32 %v708_v7, %v704_v6  ;;  %v920_v6 = vstv %s1000_s12  ;;  %v917_v7 = vmul.f32 %v916_v5, %v1662_v24 }
 0x46c   :  { %1417 = vmatpush3.msra.mxu1 %v1605_v16  ;;  %v722_v16 = vstv %s992_s5  ;;  %v921_v8 = vmul.f32 %v920_v6, %v1664_v25 }
 0x46d   :  { %v714_v14 = vadd.f32 %v713_v9, %v709_v1  ;;  %v723_v27 = vmul.f32 %v722_v16, %v1683_v43  ;;  %v925_v1 = vstv %s1001_s13 }
 0x46e   :  { %v922_v9 = vadd.f32 %v921_v8, %v917_v7  ;;  %v926_v10 = vmul.f32 %v925_v1, %v1668_v29 }
 0x46f   :  { %v719_v26 = vadd.f32 %v718_v15, %v714_v14  ;;  %v935_v14 = vstv %s1003_s15 }
 0x470   :  { %v936_v24 = vmul.f32 %v935_v14, %v1676_v38 }
 0x471   :  { %v724_v31 = vadd.f32 %v723_v27, %v719_v26 }
 0x50d   :  { %v687_v12 = vpop.f32.mrf.mxu1 }
 0x50e   :  { %v691_v13 = vadd.f32 %v687_v12, %v620_v11  ;;  %v930_v11 = vstv %s1002_s14  ;;  %v927_v12 = vadd.f32 %v926_v10, %v922_v9 }
 0x50f   :  { %v1350_v20 = vpop.f32.mrf.mxu1 }
 0x510   :  { %v692_v21 = vadd.f32 %v691_v13, %v1681_v42  ;;  %v931_v13 = vmul.f32 %v930_v11, %v1673_v34 }
 0x512   :  { %v693_v22 = vmul.f32 0.995, %v692_v21  ;;  %v932_v21 = vadd.f32 %v931_v13, %v927_v12 }
 0x514   :  { %v694_v28 = vmul.f32 0.001, %v693_v22  ;;  %v729_v51 = vmul.f32 %v693_v22, %v1742_v23  ;;  %v940_v22 = vstv %s1004_s16 }
 0x515   :  { %v941_v29 = vmul.f32 %v940_v22, %v1683_v43 }
 0x516   :  { %v695_v30 = vadd.f32 %v694_v28, %v1896_v19  ;;  %v833_v19 = vadd.f32 %v832_v63, %v828_v62  ;;  %v937_v28 = vadd.f32 %v936_v24, %v932_v21 }
 0x518   :  { %v725_v32 = vmul.f32 %v695_v30, %v1691_v54 }
 0x51a   :  { %v726_v33 = vsub.f32 %v724_v31, %v725_v32  ;;  %v942_v32 = vadd.f32 %v941_v29, %v937_v28 }
 0x51c   :  { %v727_v35 = vmul.f32 %v726_v33, %v1698_v58 }
 0x51e   :  { %v728_v36 = vadd.f32 %v727_v35, %v695_v30 }
 0x520   :  { %1384 = vmatmul.mubr.f32.vlgmr.msra.gmra.mxu0 %v728_v36 }
 0x5e0   :  { %v796_v52 = vpop.f32.mrf.mxu0 }
 0x5e1   :  { %v800_v53 = vadd.f32 %v796_v52, %v729_v51 }
 0x5e2   :  { %v1385_v59 = vpop.f32.mrf.mxu0 }
 0x5e3   :  { %v801_v60 = vadd.f32 %v800_v53, %v1681_v42 }
 0x5e5   :  { %v802_v61 = vmul.f32 0.995, %v801_v60 }
 0x5e7   :  { %v803_v17 = vmul.f32 0.001, %v802_v61  ;;  %v838_v15 = vmul.f32 %v802_v61, %v1742_v23 }
 0x5e9   :  { %v804_v18 = vadd.f32 %v803_v17, %v728_v36 }
 0x5eb   :  { %v834_v0 = vmul.f32 %v804_v18, %v1691_v54 }
 0x5ed   :  { %v835_v2 = vsub.f32 %v833_v19, %v834_v0 }
 0x5ef   :  { %v836_v3 = vmul.f32 %v835_v2, %v1698_v58 }
 0x5f1   :  { %v837_v4 = vadd.f32 %v836_v3, %v804_v18 }
 0x5f3   :  { %1419 = vmatmul.mubr.f32.vlgmr.msra.gmra.mxu1 %v837_v4 }
 0x6b3   :  { %v905_v16 = vpop.f32.mrf.mxu1 }
 0x6b4   :  { %v909_v20 = vadd.f32 %v905_v16, %v838_v15 }
 0x6b5   :  { %v1420_v25 = vpop.f32.mrf.mxu1 }
 0x6b6   :  { %v910_v26 = vadd.f32 %v909_v20, %v1681_v42 }
 0x6b8   :  { %v911_v27 = vmul.f32 0.995, %v910_v26 }
 0x6ba   :  { %v912_v30 = vmul.f32 0.001, %v911_v27 }
 0x6bc   :  { %v913_v31 = vadd.f32 %v912_v30, %v837_v4 }
 0x6be   :  { %v943_v34 = vmul.f32 %v913_v31, %v1691_v54 }
 0x6c0   :  { %v944_v33 = vsub.f32 %v942_v32, %v943_v34 }
 0x6c2   :  { %v945_v23 = vmul.f32 %v944_v33, %v1698_v58 }
 0x6c4   :  { %v946_v35 = vadd.f32 %v945_v23, %v913_v31 }
 0x6c6   :  { %947 = vst [vmem:[%s1970_s4] sm:$0x7] %v946_v35 }
 0x6c7   :  { %952 = vsyncpa [#allocation4], 1 }

</bundles_post_ra>
